<compile_context>
chip_gen: v5e
topology: v5e:2x2
jax: 0.10.0
libtpu: 0.0.40
codegen_flags: <defaults>
</compile_context>

<pallas_src>
import functools

import jax
import jax.numpy as jnp
from jax.experimental import pallas as pl
from jax.experimental.pallas import tpu as pltpu


_LANES = 128
# 64x128 = 8192 px/tile: ~1.6 MiB HBM traffic per grid step with ~50 live f32
# channels, ~3.2 MiB of double-buffered VMEM, and <= ~40 live vregs in the
# channel-major accumulation loops (no spill pressure).
_TILE_R_MAX = 64


# ----------------------------------------------------------------------------
# Fused G_stage kernel: one grid step computes one (batch, spatial-tile) block
# of all four heads (car, person, fg, bg) with VPU scalar-broadcast FMAs.
# ----------------------------------------------------------------------------
def _g_stage_kernel(
    # activations, each (C, TILE_R, 128) in VMEM (batch dim squeezed away)
    masked_img_ref, mask_ref, fg_mask_ref,
    segmap_edge_ref, segmap_ref, bg_mask_ref,
    car_mic_ref, car_imask_ref, car_mk_ref, car_sty_ref,
    per_mic_ref, per_imask_ref, per_mk_ref, per_sty_ref,
    # parameters, whole arrays resident in SMEM (scalar reads)
    w_inp_ref, b_inp_ref, w_sty_ref, b_sty_ref,
    w_fg_ref, b_fg_ref, w_bg_ref, b_bg_ref,
    # merged output (12, TILE_R, 128): car | person | fg | bg
    out_ref,
    *, n_seg,
):
    f32 = jnp.float32

    def load(ref, c):
        # one (TILE_R, 128) channel slab, upcast in-register (inputs may be bf16)
        return ref[c].astype(f32)

    def ref_ch(ref, c):
        return lambda: load(ref, c)

    def head(w_ref, b_ref, channel_fns):
        # 1x1 conv + tanh: channel-major scalar(SMEM)-broadcast FMAs on the VPU.
        # Only the 3 accumulators + the current input channel are live.
        accs = None
        for c, fn in enumerate(channel_fns):
            x = fn()
            if accs is None:
                accs = [x * w_ref[o, c] for o in range(3)]
            else:
                accs = [a + x * w_ref[o, c] for o, a in enumerate(accs)]
        return [jnp.tanh(a + b_ref[o]) for o, a in enumerate(accs)]

    def store(base, vals):
        # store each head as soon as it is computed (bounds live vregs)
        for i in range(3):
            out_ref[base + i] = vals[i].astype(out_ref.dtype)

    # ---- inst_Gs branches (car, person) -----------------------------------
    # netG_fg_inpainting over cat((masked_crop, ints_mask, mask), 1), then
    # netG_fg_style over cat((inpainted, style_img), 1).
    def inst_branch(mic_ref, imask_ref, mk_ref, sty_ref):
        inpainted = head(
            w_inp_ref, b_inp_ref,
            [ref_ch(mic_ref, c) for c in range(3)]
            + [ref_ch(imask_ref, 0), ref_ch(mk_ref, 0)])
        return head(
            w_sty_ref, b_sty_ref,
            [lambda v=v: v for v in inpainted]
            + [ref_ch(sty_ref, c) for c in range(3)])

    store(0, inst_branch(car_mic_ref, car_imask_ref, car_mk_ref, car_sty_ref))
    store(3, inst_branch(per_mic_ref, per_imask_ref, per_mk_ref, per_sty_ref))

    # ---- fg head over cat((masked_img, fg_mask), 1) ------------------------
    store(6, head(
        w_fg_ref, b_fg_ref,
        [ref_ch(masked_img_ref, c) for c in range(3)]
        + [ref_ch(fg_mask_ref, 0)]))

    # ---- bg head: bg_G(cat((masked_img, segmap_edge*bg_mask, mask), 1),
    #                    segmap, mask, bg_mask) — split-channel form ---------
    bgm = load(bg_mask_ref, 0)
    bg_channels = (
        [ref_ch(masked_img_ref, c) for c in range(3)]
        + [lambda c=c: load(segmap_edge_ref, c) * bgm for c in range(n_seg)]
        + [ref_ch(mask_ref, 0)]
        + [ref_ch(segmap_ref, c) for c in range(n_seg)]
        + [ref_ch(mask_ref, 0), lambda: bgm])
    store(9, head(w_bg_ref, b_bg_ref, bg_channels))


# ----------------------------------------------------------------------------
# Jitted wrapper: reshape NCHW -> (N, C, rows, 128), one gridded pallas_call,
# slice the merged 12-channel output back into the four heads.
# ----------------------------------------------------------------------------
@functools.partial(jax.jit, static_argnames=("n_seg",))
def _g_stage_forward(
    masked_img, mask, fg_mask, segmap_edge, segmap, bg_mask,
    car_mic, car_imask, car_mk, car_sty,
    per_mic, per_imask, per_mk, per_sty,
    w_inp, b_inp, w_sty, b_sty, w_fg, b_fg, w_bg, b_bg,
    *, n_seg,
):
    N, _, H, W = masked_img.shape
    HW = H * W

    # Fold flattened spatial dim into (rows, 128) so every channel is a
    # lane-dense, sublane-dense 2-D slab; pad only if HW is not 128-aligned.
    rows = -(-HW // _LANES)
    tile_r = min(_TILE_R_MAX, rows)
    rows_pad = -(-rows // tile_r) * tile_r
    hw_pad = rows_pad * _LANES

    def prep(x):
        c = x.shape[1]
        xf = x.reshape(N, c, HW)
        if hw_pad != HW:
            xf = jnp.pad(xf, ((0, 0), (0, 0), (0, hw_pad - HW)))
        return xf.reshape(N, c, rows_pad, _LANES)

    acts = [prep(a) for a in (
        masked_img, mask, fg_mask, segmap_edge, segmap, bg_mask,
        car_mic, car_imask, car_mk, car_sty,
        per_mic, per_imask, per_mk, per_sty)]
    params = [w_inp, b_inp, w_sty, b_sty, w_fg, b_fg, w_bg, b_bg]

    def act_spec(c):
        return pl.BlockSpec((None, c, tile_r, _LANES),
                            lambda n, t: (n, 0, t, 0))

    smem_spec = pl.BlockSpec(memory_space=pltpu.MemorySpace.SMEM)

    out = pl.pallas_call(
        functools.partial(_g_stage_kernel, n_seg=n_seg),
        out_shape=jax.ShapeDtypeStruct((N, 12, rows_pad, _LANES), jnp.float32),
        grid=(N, rows_pad // tile_r),
        in_specs=[act_spec(a.shape[1]) for a in acts] + [smem_spec] * len(params),
        out_specs=pl.BlockSpec((None, 12, tile_r, _LANES),
                               lambda n, t: (n, 0, t, 0)),
        compiler_params=pltpu.CompilerParams(
            dimension_semantics=("parallel", "parallel"),
            vmem_limit_bytes=32 * 1024 * 1024),
    )(*acts, *params)

    out = out.reshape(N, 12, hw_pad)[:, :, :HW].reshape(N, 12, H, W)
    return out[:, 0:3], out[:, 3:6], out[:, 6:9], out[:, 9:12]


# ----------------------------------------------------------------------------
# G_stage wrapper (same head shapes / init as before)
# ----------------------------------------------------------------------------
def _init_head(key, cout, cin):
    kw, kb = jax.random.split(key)
    w = (0.3 / jnp.sqrt(cin)) * jax.random.normal(kw, (cout, cin), jnp.float32)
    b = 0.01 * jax.random.normal(kb, (cout,), jnp.float32)
    return w, b


class GStagePallas:
    def __init__(self, key, n_seg=8):
        self.n_seg = n_seg
        k = jax.random.split(key, 4)
        # netG_fg_inpainting: (masked_crop 3 + ints_mask 1 + mask 1) -> 3
        self.w_inpaint, self.b_inpaint = _init_head(k[0], 3, 5)
        # netG_fg_style: (inpainted 3 + style img 3) -> 3
        self.w_style, self.b_style = _init_head(k[1], 3, 6)
        # fg composite head: (masked_img 3 + fg_mask 1) -> 3
        self.w_fg, self.b_fg = _init_head(k[2], 3, 4)
        # bg_G input column order baked into the kernel:
        #   masked_img(3) | segmap_edge*bg_mask(n_seg) | mask(1) | segmap(n_seg) | mask(1) | bg_mask(1)
        self.w_bg, self.b_bg = _init_head(k[3], 3, 2 * n_seg + 6)
        assert self.w_bg.shape == (3, 2 * n_seg + 6)

    def __call__(self, gt, masked_img, mask, fg_mask,
                 car_gt_crop, car_gt_crop2048, car_masked_img_crop,
                 car_ints_mask_crop, car_mask_crop, car_inst_cors,
                 person_gt_crop, person_gt_crop2048, person_masked_img_crop,
                 person_ints_mask_crop, person_mask_crop, person_inst_cors,
                 segmap_edge, segmap, bg_mask,
                 car_sty_images, car_sty_inst_images,
                 person_sty_images, person_sty_inst_images):
        car_out, person_out, fg_output, bg_output = _g_stage_forward(
            masked_img, mask, fg_mask, segmap_edge, segmap, bg_mask,
            car_masked_img_crop, car_ints_mask_crop, car_mask_crop, car_sty_images,
            person_masked_img_crop, person_ints_mask_crop, person_mask_crop,
            person_sty_images,
            self.w_inpaint, self.b_inpaint, self.w_style, self.b_style,
            self.w_fg, self.b_fg, self.w_bg, self.b_bg,
            n_seg=self.n_seg,
        )
        inst_output_list = [car_out, person_out]
        return inst_output_list, fg_output, bg_output


# ----------------------------------------------------------------------------
if __name__ == "__main__":
    key = jax.random.PRNGKey(0)
    keys = jax.random.split(key, 32)
    N, H, W = 2, 16, 16
    NSEG = 8
    f32 = jnp.float32

    def rnd(k, shape):
        return jax.random.normal(keys[k], shape, f32)

    gt = rnd(0, (N, 3, H, W))
    masked_img = rnd(1, (N, 3, H, W))
    mask = (jax.random.uniform(keys[2], (N, 1, H, W)) > 0.5).astype(f32)
    fg_mask = (jax.random.uniform(keys[3], (N, 1, H, W)) > 0.5).astype(f32)

    car_gt_crop = rnd(4, (N, 3, H, W))
    car_gt_crop2048 = rnd(5, (N, 3, H, W))
    car_masked_img_crop = rnd(6, (N, 3, H, W))
    car_ints_mask_crop = (jax.random.uniform(keys[7], (N, 1, H, W)) > 0.5).astype(f32)
    car_mask_crop = (jax.random.uniform(keys[8], (N, 1, H, W)) > 0.5).astype(f32)
    car_inst_cors = jax.random.randint(keys[9], (N, 4), 0, H).astype(jnp.int32)

    person_gt_crop = rnd(10, (N, 3, H, W))
    person_gt_crop2048 = rnd(11, (N, 3, H, W))
    person_masked_img_crop = rnd(12, (N, 3, H, W))
    person_ints_mask_crop = (jax.random.uniform(keys[13], (N, 1, H, W)) > 0.5).astype(f32)
    person_mask_crop = (jax.random.uniform(keys[14], (N, 1, H, W)) > 0.5).astype(f32)
    person_inst_cors = jax.random.randint(keys[15], (N, 4), 0, H).astype(jnp.int32)

    segmap_edge = rnd(16, (N, NSEG, H, W))
    segmap = rnd(17, (N, NSEG, H, W))
    bg_mask = (jax.random.uniform(keys[18], (N, 1, H, W)) > 0.5).astype(f32)

    car_sty_images = rnd(19, (N, 3, H, W))
    car_sty_inst_images = rnd(20, (N, 3, H, W))
    person_sty_images = rnd(21, (N, 3, H, W))
    person_sty_inst_images = rnd(22, (N, 3, H, W))

    model = GStagePallas(jax.random.PRNGKey(42), n_seg=NSEG)

    inst_output_list, fg_output, bg_output = model(
        gt, masked_img, mask, fg_mask,
        car_gt_crop, car_gt_crop2048, car_masked_img_crop,
        car_ints_mask_crop, car_mask_crop, car_inst_cors,
        person_gt_crop, person_gt_crop2048, person_masked_img_crop,
        person_ints_mask_crop, person_mask_crop, person_inst_cors,
        segmap_edge, segmap, bg_mask,
        car_sty_images, car_sty_inst_images,
        person_sty_images, person_sty_inst_images,
    )

    for o in inst_output_list:
        jax.block_until_ready(o)
    jax.block_until_ready(fg_output)
    jax.block_until_ready(bg_output)

    assert fg_output.shape == (N, 3, H, W)
    assert bg_output.shape == (N, 3, H, W)
    assert inst_output_list[0].shape == (N, 3, H, W)
    assert inst_output_list[1].shape == (N, 3, H, W)
    assert bool(jnp.all(jnp.isfinite(fg_output)))
    assert bool(jnp.all(jnp.isfinite(bg_output)))
    print("KERNEL_OK")
</pallas_src>

<mosaic_0001>
module attributes {stable_mosaic.version = 11 : i64} {
  func.func @_g_stage_kernel(%arg0: i32, %arg1: i32, %arg2: memref<1x3x2x128xf32, #tpu.memory_space<vmem>>, %arg3: memref<1x1x2x128xf32, #tpu.memory_space<vmem>>, %arg4: memref<1x1x2x128xf32, #tpu.memory_space<vmem>>, %arg5: memref<1x8x2x128xf32, #tpu.memory_space<vmem>>, %arg6: memref<1x8x2x128xf32, #tpu.memory_space<vmem>>, %arg7: memref<1x1x2x128xf32, #tpu.memory_space<vmem>>, %arg8: memref<1x3x2x128xf32, #tpu.memory_space<vmem>>, %arg9: memref<1x1x2x128xf32, #tpu.memory_space<vmem>>, %arg10: memref<1x1x2x128xf32, #tpu.memory_space<vmem>>, %arg11: memref<1x3x2x128xf32, #tpu.memory_space<vmem>>, %arg12: memref<1x3x2x128xf32, #tpu.memory_space<vmem>>, %arg13: memref<1x1x2x128xf32, #tpu.memory_space<vmem>>, %arg14: memref<1x1x2x128xf32, #tpu.memory_space<vmem>>, %arg15: memref<1x3x2x128xf32, #tpu.memory_space<vmem>>, %arg16: memref<3x5xf32, #tpu.memory_space<smem>>, %arg17: memref<3xf32, #tpu.memory_space<smem>>, %arg18: memref<3x6xf32, #tpu.memory_space<smem>>, %arg19: memref<3xf32, #tpu.memory_space<smem>>, %arg20: memref<3x4xf32, #tpu.memory_space<smem>>, %arg21: memref<3xf32, #tpu.memory_space<smem>>, %arg22: memref<3x22xf32, #tpu.memory_space<smem>>, %arg23: memref<3xf32, #tpu.memory_space<smem>>, %arg24: memref<1x12x2x128xf32, #tpu.memory_space<vmem>>) attributes {dimension_semantics = [#tpu.dimension_semantics<parallel>, #tpu.dimension_semantics<parallel>], iteration_bounds = array<i64: 2, 1>, scalar_prefetch = 0 : i64, scratch_operands = 0 : i64, tpu.core_type = #tpu.core_type<tc>, window_params = [{transform_indices = @transform_0, window_bounds = array<i64: 1, 3, 2, 128>}, {transform_indices = @transform_1, window_bounds = array<i64: 1, 1, 2, 128>}, {transform_indices = @transform_2, window_bounds = array<i64: 1, 1, 2, 128>}, {transform_indices = @transform_3, window_bounds = array<i64: 1, 8, 2, 128>}, {transform_indices = @transform_4, window_bounds = array<i64: 1, 8, 2, 128>}, {transform_indices = @transform_5, window_bounds = array<i64: 1, 1, 2, 128>}, {transform_indices = @transform_6, window_bounds = array<i64: 1, 3, 2, 128>}, {transform_indices = @transform_7, window_bounds = array<i64: 1, 1, 2, 128>}, {transform_indices = @transform_8, window_bounds = array<i64: 1, 1, 2, 128>}, {transform_indices = @transform_9, window_bounds = array<i64: 1, 3, 2, 128>}, {transform_indices = @transform_10, window_bounds = array<i64: 1, 3, 2, 128>}, {transform_indices = @transform_11, window_bounds = array<i64: 1, 1, 2, 128>}, {transform_indices = @transform_12, window_bounds = array<i64: 1, 1, 2, 128>}, {transform_indices = @transform_13, window_bounds = array<i64: 1, 3, 2, 128>}, {transform_indices = @transform_14, window_bounds = array<i64: 3, 5>}, {transform_indices = @transform_15, window_bounds = array<i64: 3>}, {transform_indices = @transform_16, window_bounds = array<i64: 3, 6>}, {transform_indices = @transform_17, window_bounds = array<i64: 3>}, {transform_indices = @transform_18, window_bounds = array<i64: 3, 4>}, {transform_indices = @transform_19, window_bounds = array<i64: 3>}, {transform_indices = @transform_20, window_bounds = array<i64: 3, 22>}, {transform_indices = @transform_21, window_bounds = array<i64: 3>}, {transform_indices = @transform_22, window_bounds = array<i64: 1, 12, 2, 128>}]} {
    %c0 = arith.constant 0 : index
    %c0_0 = arith.constant 0 : index
    %c0_1 = arith.constant 0 : index
    %c0_2 = arith.constant 0 : index
    %0 = vector.load %arg8[%c0, %c0_0, %c0_1, %c0_2] : memref<1x3x2x128xf32, #tpu.memory_space<vmem>>, vector<1x1x2x128xf32>
    %1 = vector.shape_cast %0 : vector<1x1x2x128xf32> to vector<2x128xf32>
    %c0_3 = arith.constant 0 : index
    %c0_4 = arith.constant 0 : index
    %2 = memref.load %arg16[%c0_3, %c0_4] : memref<3x5xf32, #tpu.memory_space<smem>>
    %3 = vector.broadcast %2 : f32 to vector<2x128xf32>
    %4 = arith.mulf %1, %3 : vector<2x128xf32>
    %c1 = arith.constant 1 : index
    %c0_5 = arith.constant 0 : index
    %5 = memref.load %arg16[%c1, %c0_5] : memref<3x5xf32, #tpu.memory_space<smem>>
    %6 = vector.broadcast %5 : f32 to vector<2x128xf32>
    %7 = arith.mulf %1, %6 : vector<2x128xf32>
    %c2 = arith.constant 2 : index
    %c0_6 = arith.constant 0 : index
    %8 = memref.load %arg16[%c2, %c0_6] : memref<3x5xf32, #tpu.memory_space<smem>>
    %9 = vector.broadcast %8 : f32 to vector<2x128xf32>
    %10 = arith.mulf %1, %9 : vector<2x128xf32>
    %c0_7 = arith.constant 0 : index
    %c1_8 = arith.constant 1 : index
    %c0_9 = arith.constant 0 : index
    %c0_10 = arith.constant 0 : index
    %11 = vector.load %arg8[%c0_7, %c1_8, %c0_9, %c0_10] : memref<1x3x2x128xf32, #tpu.memory_space<vmem>>, vector<1x1x2x128xf32>
    %12 = vector.shape_cast %11 : vector<1x1x2x128xf32> to vector<2x128xf32>
    %c0_11 = arith.constant 0 : index
    %c1_12 = arith.constant 1 : index
    %13 = memref.load %arg16[%c0_11, %c1_12] : memref<3x5xf32, #tpu.memory_space<smem>>
    %14 = vector.broadcast %13 : f32 to vector<2x128xf32>
    %15 = arith.mulf %12, %14 : vector<2x128xf32>
    %16 = arith.addf %4, %15 : vector<2x128xf32>
    %c1_13 = arith.constant 1 : index
    %c1_14 = arith.constant 1 : index
    %17 = memref.load %arg16[%c1_13, %c1_14] : memref<3x5xf32, #tpu.memory_space<smem>>
    %18 = vector.broadcast %17 : f32 to vector<2x128xf32>
    %19 = arith.mulf %12, %18 : vector<2x128xf32>
    %20 = arith.addf %7, %19 : vector<2x128xf32>
    %c2_15 = arith.constant 2 : index
    %c1_16 = arith.constant 1 : index
    %21 = memref.load %arg16[%c2_15, %c1_16] : memref<3x5xf32, #tpu.memory_space<smem>>
    %22 = vector.broadcast %21 : f32 to vector<2x128xf32>
    %23 = arith.mulf %12, %22 : vector<2x128xf32>
    %24 = arith.addf %10, %23 : vector<2x128xf32>
    %c0_17 = arith.constant 0 : index
    %c2_18 = arith.constant 2 : index
    %c0_19 = arith.constant 0 : index
    %c0_20 = arith.constant 0 : index
    %25 = vector.load %arg8[%c0_17, %c2_18, %c0_19, %c0_20] : memref<1x3x2x128xf32, #tpu.memory_space<vmem>>, vector<1x1x2x128xf32>
    %26 = vector.shape_cast %25 : vector<1x1x2x128xf32> to vector<2x128xf32>
    %c0_21 = arith.constant 0 : index
    %c2_22 = arith.constant 2 : index
    %27 = memref.load %arg16[%c0_21, %c2_22] : memref<3x5xf32, #tpu.memory_space<smem>>
    %28 = vector.broadcast %27 : f32 to vector<2x128xf32>
    %29 = arith.mulf %26, %28 : vector<2x128xf32>
    %30 = arith.addf %16, %29 : vector<2x128xf32>
    %c1_23 = arith.constant 1 : index
    %c2_24 = arith.constant 2 : index
    %31 = memref.load %arg16[%c1_23, %c2_24] : memref<3x5xf32, #tpu.memory_space<smem>>
    %32 = vector.broadcast %31 : f32 to vector<2x128xf32>
    %33 = arith.mulf %26, %32 : vector<2x128xf32>
    %34 = arith.addf %20, %33 : vector<2x128xf32>
    %c2_25 = arith.constant 2 : index
    %c2_26 = arith.constant 2 : index
    %35 = memref.load %arg16[%c2_25, %c2_26] : memref<3x5xf32, #tpu.memory_space<smem>>
    %36 = vector.broadcast %35 : f32 to vector<2x128xf32>
    %37 = arith.mulf %26, %36 : vector<2x128xf32>
    %38 = arith.addf %24, %37 : vector<2x128xf32>
    %c0_27 = arith.constant 0 : index
    %c0_28 = arith.constant 0 : index
    %c0_29 = arith.constant 0 : index
    %c0_30 = arith.constant 0 : index
    %39 = vector.load %arg9[%c0_27, %c0_28, %c0_29, %c0_30] : memref<1x1x2x128xf32, #tpu.memory_space<vmem>>, vector<1x1x2x128xf32>
    %40 = vector.shape_cast %39 : vector<1x1x2x128xf32> to vector<2x128xf32>
    %c0_31 = arith.constant 0 : index
    %c3 = arith.constant 3 : index
    %41 = memref.load %arg16[%c0_31, %c3] : memref<3x5xf32, #tpu.memory_space<smem>>
    %42 = vector.broadcast %41 : f32 to vector<2x128xf32>
    %43 = arith.mulf %40, %42 : vector<2x128xf32>
    %44 = arith.addf %30, %43 : vector<2x128xf32>
    %c1_32 = arith.constant 1 : index
    %c3_33 = arith.constant 3 : index
    %45 = memref.load %arg16[%c1_32, %c3_33] : memref<3x5xf32, #tpu.memory_space<smem>>
    %46 = vector.broadcast %45 : f32 to vector<2x128xf32>
    %47 = arith.mulf %40, %46 : vector<2x128xf32>
    %48 = arith.addf %34, %47 : vector<2x128xf32>
    %c2_34 = arith.constant 2 : index
    %c3_35 = arith.constant 3 : index
    %49 = memref.load %arg16[%c2_34, %c3_35] : memref<3x5xf32, #tpu.memory_space<smem>>
    %50 = vector.broadcast %49 : f32 to vector<2x128xf32>
    %51 = arith.mulf %40, %50 : vector<2x128xf32>
    %52 = arith.addf %38, %51 : vector<2x128xf32>
    %c0_36 = arith.constant 0 : index
    %c0_37 = arith.constant 0 : index
    %c0_38 = arith.constant 0 : index
    %c0_39 = arith.constant 0 : index
    %53 = vector.load %arg10[%c0_36, %c0_37, %c0_38, %c0_39] : memref<1x1x2x128xf32, #tpu.memory_space<vmem>>, vector<1x1x2x128xf32>
    %54 = vector.shape_cast %53 : vector<1x1x2x128xf32> to vector<2x128xf32>
    %c0_40 = arith.constant 0 : index
    %c4 = arith.constant 4 : index
    %55 = memref.load %arg16[%c0_40, %c4] : memref<3x5xf32, #tpu.memory_space<smem>>
    %56 = vector.broadcast %55 : f32 to vector<2x128xf32>
    %57 = arith.mulf %54, %56 : vector<2x128xf32>
    %58 = arith.addf %44, %57 : vector<2x128xf32>
    %c1_41 = arith.constant 1 : index
    %c4_42 = arith.constant 4 : index
    %59 = memref.load %arg16[%c1_41, %c4_42] : memref<3x5xf32, #tpu.memory_space<smem>>
    %60 = vector.broadcast %59 : f32 to vector<2x128xf32>
    %61 = arith.mulf %54, %60 : vector<2x128xf32>
    %62 = arith.addf %48, %61 : vector<2x128xf32>
    %c2_43 = arith.constant 2 : index
    %c4_44 = arith.constant 4 : index
    %63 = memref.load %arg16[%c2_43, %c4_44] : memref<3x5xf32, #tpu.memory_space<smem>>
    %64 = vector.broadcast %63 : f32 to vector<2x128xf32>
    %65 = arith.mulf %54, %64 : vector<2x128xf32>
    %66 = arith.addf %52, %65 : vector<2x128xf32>
    %c0_45 = arith.constant 0 : index
    %67 = memref.load %arg17[%c0_45] : memref<3xf32, #tpu.memory_space<smem>>
    %68 = vector.broadcast %67 : f32 to vector<2x128xf32>
    %69 = arith.addf %58, %68 : vector<2x128xf32>
    %70 = math.tanh %69 : vector<2x128xf32>
    %c1_46 = arith.constant 1 : index
    %71 = memref.load %arg17[%c1_46] : memref<3xf32, #tpu.memory_space<smem>>
    %72 = vector.broadcast %71 : f32 to vector<2x128xf32>
    %73 = arith.addf %62, %72 : vector<2x128xf32>
    %74 = math.tanh %73 : vector<2x128xf32>
    %c2_47 = arith.constant 2 : index
    %75 = memref.load %arg17[%c2_47] : memref<3xf32, #tpu.memory_space<smem>>
    %76 = vector.broadcast %75 : f32 to vector<2x128xf32>
    %77 = arith.addf %66, %76 : vector<2x128xf32>
    %78 = math.tanh %77 : vector<2x128xf32>
    %c0_48 = arith.constant 0 : index
    %c0_49 = arith.constant 0 : index
    %79 = memref.load %arg18[%c0_48, %c0_49] : memref<3x6xf32, #tpu.memory_space<smem>>
    %80 = vector.broadcast %79 : f32 to vector<2x128xf32>
    %81 = arith.mulf %70, %80 : vector<2x128xf32>
    %c1_50 = arith.constant 1 : index
    %c0_51 = arith.constant 0 : index
    %82 = memref.load %arg18[%c1_50, %c0_51] : memref<3x6xf32, #tpu.memory_space<smem>>
    %83 = vector.broadcast %82 : f32 to vector<2x128xf32>
    %84 = arith.mulf %70, %83 : vector<2x128xf32>
    %c2_52 = arith.constant 2 : index
    %c0_53 = arith.constant 0 : index
    %85 = memref.load %arg18[%c2_52, %c0_53] : memref<3x6xf32, #tpu.memory_space<smem>>
    %86 = vector.broadcast %85 : f32 to vector<2x128xf32>
    %87 = arith.mulf %70, %86 : vector<2x128xf32>
    %c0_54 = arith.constant 0 : index
    %c1_55 = arith.constant 1 : index
    %88 = memref.load %arg18[%c0_54, %c1_55] : memref<3x6xf32, #tpu.memory_space<smem>>
    %89 = vector.broadcast %88 : f32 to vector<2x128xf32>
    %90 = arith.mulf %74, %89 : vector<2x128xf32>
    %91 = arith.addf %81, %90 : vector<2x128xf32>
    %c1_56 = arith.constant 1 : index
    %c1_57 = arith.constant 1 : index
    %92 = memref.load %arg18[%c1_56, %c1_57] : memref<3x6xf32, #tpu.memory_space<smem>>
    %93 = vector.broadcast %92 : f32 to vector<2x128xf32>
    %94 = arith.mulf %74, %93 : vector<2x128xf32>
    %95 = arith.addf %84, %94 : vector<2x128xf32>
    %c2_58 = arith.constant 2 : index
    %c1_59 = arith.constant 1 : index
    %96 = memref.load %arg18[%c2_58, %c1_59] : memref<3x6xf32, #tpu.memory_space<smem>>
    %97 = vector.broadcast %96 : f32 to vector<2x128xf32>
    %98 = arith.mulf %74, %97 : vector<2x128xf32>
    %99 = arith.addf %87, %98 : vector<2x128xf32>
    %c0_60 = arith.constant 0 : index
    %c2_61 = arith.constant 2 : index
    %100 = memref.load %arg18[%c0_60, %c2_61] : memref<3x6xf32, #tpu.memory_space<smem>>
    %101 = vector.broadcast %100 : f32 to vector<2x128xf32>
    %102 = arith.mulf %78, %101 : vector<2x128xf32>
    %103 = arith.addf %91, %102 : vector<2x128xf32>
    %c1_62 = arith.constant 1 : index
    %c2_63 = arith.constant 2 : index
    %104 = memref.load %arg18[%c1_62, %c2_63] : memref<3x6xf32, #tpu.memory_space<smem>>
    %105 = vector.broadcast %104 : f32 to vector<2x128xf32>
    %106 = arith.mulf %78, %105 : vector<2x128xf32>
    %107 = arith.addf %95, %106 : vector<2x128xf32>
    %c2_64 = arith.constant 2 : index
    %c2_65 = arith.constant 2 : index
    %108 = memref.load %arg18[%c2_64, %c2_65] : memref<3x6xf32, #tpu.memory_space<smem>>
    %109 = vector.broadcast %108 : f32 to vector<2x128xf32>
    %110 = arith.mulf %78, %109 : vector<2x128xf32>
    %111 = arith.addf %99, %110 : vector<2x128xf32>
    %c0_66 = arith.constant 0 : index
    %c0_67 = arith.constant 0 : index
    %c0_68 = arith.constant 0 : index
    %c0_69 = arith.constant 0 : index
    %112 = vector.load %arg11[%c0_66, %c0_67, %c0_68, %c0_69] : memref<1x3x2x128xf32, #tpu.memory_space<vmem>>, vector<1x1x2x128xf32>
    %113 = vector.shape_cast %112 : vector<1x1x2x128xf32> to vector<2x128xf32>
    %c0_70 = arith.constant 0 : index
    %c3_71 = arith.constant 3 : index
    %114 = memref.load %arg18[%c0_70, %c3_71] : memref<3x6xf32, #tpu.memory_space<smem>>
    %115 = vector.broadcast %114 : f32 to vector<2x128xf32>
    %116 = arith.mulf %113, %115 : vector<2x128xf32>
    %117 = arith.addf %103, %116 : vector<2x128xf32>
    %c1_72 = arith.constant 1 : index
    %c3_73 = arith.constant 3 : index
    %118 = memref.load %arg18[%c1_72, %c3_73] : memref<3x6xf32, #tpu.memory_space<smem>>
    %119 = vector.broadcast %118 : f32 to vector<2x128xf32>
    %120 = arith.mulf %113, %119 : vector<2x128xf32>
    %121 = arith.addf %107, %120 : vector<2x128xf32>
    %c2_74 = arith.constant 2 : index
    %c3_75 = arith.constant 3 : index
    %122 = memref.load %arg18[%c2_74, %c3_75] : memref<3x6xf32, #tpu.memory_space<smem>>
    %123 = vector.broadcast %122 : f32 to vector<2x128xf32>
    %124 = arith.mulf %113, %123 : vector<2x128xf32>
    %125 = arith.addf %111, %124 : vector<2x128xf32>
    %c0_76 = arith.constant 0 : index
    %c1_77 = arith.constant 1 : index
    %c0_78 = arith.constant 0 : index
    %c0_79 = arith.constant 0 : index
    %126 = vector.load %arg11[%c0_76, %c1_77, %c0_78, %c0_79] : memref<1x3x2x128xf32, #tpu.memory_space<vmem>>, vector<1x1x2x128xf32>
    %127 = vector.shape_cast %126 : vector<1x1x2x128xf32> to vector<2x128xf32>
    %c0_80 = arith.constant 0 : index
    %c4_81 = arith.constant 4 : index
    %128 = memref.load %arg18[%c0_80, %c4_81] : memref<3x6xf32, #tpu.memory_space<smem>>
    %129 = vector.broadcast %128 : f32 to vector<2x128xf32>
    %130 = arith.mulf %127, %129 : vector<2x128xf32>
    %131 = arith.addf %117, %130 : vector<2x128xf32>
    %c1_82 = arith.constant 1 : index
    %c4_83 = arith.constant 4 : index
    %132 = memref.load %arg18[%c1_82, %c4_83] : memref<3x6xf32, #tpu.memory_space<smem>>
    %133 = vector.broadcast %132 : f32 to vector<2x128xf32>
    %134 = arith.mulf %127, %133 : vector<2x128xf32>
    %135 = arith.addf %121, %134 : vector<2x128xf32>
    %c2_84 = arith.constant 2 : index
    %c4_85 = arith.constant 4 : index
    %136 = memref.load %arg18[%c2_84, %c4_85] : memref<3x6xf32, #tpu.memory_space<smem>>
    %137 = vector.broadcast %136 : f32 to vector<2x128xf32>
    %138 = arith.mulf %127, %137 : vector<2x128xf32>
    %139 = arith.addf %125, %138 : vector<2x128xf32>
    %c0_86 = arith.constant 0 : index
    %c2_87 = arith.constant 2 : index
    %c0_88 = arith.constant 0 : index
    %c0_89 = arith.constant 0 : index
    %140 = vector.load %arg11[%c0_86, %c2_87, %c0_88, %c0_89] : memref<1x3x2x128xf32, #tpu.memory_space<vmem>>, vector<1x1x2x128xf32>
    %141 = vector.shape_cast %140 : vector<1x1x2x128xf32> to vector<2x128xf32>
    %c0_90 = arith.constant 0 : index
    %c5 = arith.constant 5 : index
    %142 = memref.load %arg18[%c0_90, %c5] : memref<3x6xf32, #tpu.memory_space<smem>>
    %143 = vector.broadcast %142 : f32 to vector<2x128xf32>
    %144 = arith.mulf %141, %143 : vector<2x128xf32>
    %145 = arith.addf %131, %144 : vector<2x128xf32>
    %c1_91 = arith.constant 1 : index
    %c5_92 = arith.constant 5 : index
    %146 = memref.load %arg18[%c1_91, %c5_92] : memref<3x6xf32, #tpu.memory_space<smem>>
    %147 = vector.broadcast %146 : f32 to vector<2x128xf32>
    %148 = arith.mulf %141, %147 : vector<2x128xf32>
    %149 = arith.addf %135, %148 : vector<2x128xf32>
    %c2_93 = arith.constant 2 : index
    %c5_94 = arith.constant 5 : index
    %150 = memref.load %arg18[%c2_93, %c5_94] : memref<3x6xf32, #tpu.memory_space<smem>>
    %151 = vector.broadcast %150 : f32 to vector<2x128xf32>
    %152 = arith.mulf %141, %151 : vector<2x128xf32>
    %153 = arith.addf %139, %152 : vector<2x128xf32>
    %c0_95 = arith.constant 0 : index
    %154 = memref.load %arg19[%c0_95] : memref<3xf32, #tpu.memory_space<smem>>
    %155 = vector.broadcast %154 : f32 to vector<2x128xf32>
    %156 = arith.addf %145, %155 : vector<2x128xf32>
    %157 = math.tanh %156 : vector<2x128xf32>
    %c1_96 = arith.constant 1 : index
    %158 = memref.load %arg19[%c1_96] : memref<3xf32, #tpu.memory_space<smem>>
    %159 = vector.broadcast %158 : f32 to vector<2x128xf32>
    %160 = arith.addf %149, %159 : vector<2x128xf32>
    %161 = math.tanh %160 : vector<2x128xf32>
    %c2_97 = arith.constant 2 : index
    %162 = memref.load %arg19[%c2_97] : memref<3xf32, #tpu.memory_space<smem>>
    %163 = vector.broadcast %162 : f32 to vector<2x128xf32>
    %164 = arith.addf %153, %163 : vector<2x128xf32>
    %165 = math.tanh %164 : vector<2x128xf32>
    %c0_98 = arith.constant 0 : index
    %c0_99 = arith.constant 0 : index
    %c0_100 = arith.constant 0 : index
    %c0_101 = arith.constant 0 : index
    %166 = vector.load %arg24[%c0_98, %c0_99, %c0_100, %c0_101] : memref<1x12x2x128xf32, #tpu.memory_space<vmem>>, vector<1x1x2x128xf32>
    %167 = vector.shape_cast %166 : vector<1x1x2x128xf32> to vector<2x128xf32>
    %168 = vector.shape_cast %157 : vector<2x128xf32> to vector<1x1x2x128xf32>
    tpu.vector_store %arg24[%c0_98, %c0_99, %c0_100, %c0_101], %168 {strides = array<i32>} : memref<1x12x2x128xf32, #tpu.memory_space<vmem>>, vector<1x1x2x128xf32>,
    %c0_102 = arith.constant 0 : index
    %c1_103 = arith.constant 1 : index
    %c0_104 = arith.constant 0 : index
    %c0_105 = arith.constant 0 : index
    %169 = vector.load %arg24[%c0_102, %c1_103, %c0_104, %c0_105] : memref<1x12x2x128xf32, #tpu.memory_space<vmem>>, vector<1x1x2x128xf32>
    %170 = vector.shape_cast %169 : vector<1x1x2x128xf32> to vector<2x128xf32>
    %171 = vector.shape_cast %161 : vector<2x128xf32> to vector<1x1x2x128xf32>
    tpu.vector_store %arg24[%c0_102, %c1_103, %c0_104, %c0_105], %171 {strides = array<i32>} : memref<1x12x2x128xf32, #tpu.memory_space<vmem>>, vector<1x1x2x128xf32>,
    %c0_106 = arith.constant 0 : index
    %c2_107 = arith.constant 2 : index
    %c0_108 = arith.constant 0 : index
    %c0_109 = arith.constant 0 : index
    %172 = vector.load %arg24[%c0_106, %c2_107, %c0_108, %c0_109] : memref<1x12x2x128xf32, #tpu.memory_space<vmem>>, vector<1x1x2x128xf32>
    %173 = vector.shape_cast %172 : vector<1x1x2x128xf32> to vector<2x128xf32>
    %174 = vector.shape_cast %165 : vector<2x128xf32> to vector<1x1x2x128xf32>
    tpu.vector_store %arg24[%c0_106, %c2_107, %c0_108, %c0_109], %174 {strides = array<i32>} : memref<1x12x2x128xf32, #tpu.memory_space<vmem>>, vector<1x1x2x128xf32>,
    %c0_110 = arith.constant 0 : index
    %c0_111 = arith.constant 0 : index
    %c0_112 = arith.constant 0 : index
    %c0_113 = arith.constant 0 : index
    %175 = vector.load %arg12[%c0_110, %c0_111, %c0_112, %c0_113] : memref<1x3x2x128xf32, #tpu.memory_space<vmem>>, vector<1x1x2x128xf32>
    %176 = vector.shape_cast %175 : vector<1x1x2x128xf32> to vector<2x128xf32>
    %c0_114 = arith.constant 0 : index
    %c0_115 = arith.constant 0 : index
    %177 = memref.load %arg16[%c0_114, %c0_115] : memref<3x5xf32, #tpu.memory_space<smem>>
    %178 = vector.broadcast %177 : f32 to vector<2x128xf32>
    %179 = arith.mulf %176, %178 : vector<2x128xf32>
    %c1_116 = arith.constant 1 : index
    %c0_117 = arith.constant 0 : index
    %180 = memref.load %arg16[%c1_116, %c0_117] : memref<3x5xf32, #tpu.memory_space<smem>>
    %181 = vector.broadcast %180 : f32 to vector<2x128xf32>
    %182 = arith.mulf %176, %181 : vector<2x128xf32>
    %c2_118 = arith.constant 2 : index
    %c0_119 = arith.constant 0 : index
    %183 = memref.load %arg16[%c2_118, %c0_119] : memref<3x5xf32, #tpu.memory_space<smem>>
    %184 = vector.broadcast %183 : f32 to vector<2x128xf32>
    %185 = arith.mulf %176, %184 : vector<2x128xf32>
    %c0_120 = arith.constant 0 : index
    %c1_121 = arith.constant 1 : index
    %c0_122 = arith.constant 0 : index
    %c0_123 = arith.constant 0 : index
    %186 = vector.load %arg12[%c0_120, %c1_121, %c0_122, %c0_123] : memref<1x3x2x128xf32, #tpu.memory_space<vmem>>, vector<1x1x2x128xf32>
    %187 = vector.shape_cast %186 : vector<1x1x2x128xf32> to vector<2x128xf32>
    %c0_124 = arith.constant 0 : index
    %c1_125 = arith.constant 1 : index
    %188 = memref.load %arg16[%c0_124, %c1_125] : memref<3x5xf32, #tpu.memory_space<smem>>
    %189 = vector.broadcast %188 : f32 to vector<2x128xf32>
    %190 = arith.mulf %187, %189 : vector<2x128xf32>
    %191 = arith.addf %179, %190 : vector<2x128xf32>
    %c1_126 = arith.constant 1 : index
    %c1_127 = arith.constant 1 : index
    %192 = memref.load %arg16[%c1_126, %c1_127] : memref<3x5xf32, #tpu.memory_space<smem>>
    %193 = vector.broadcast %192 : f32 to vector<2x128xf32>
    %194 = arith.mulf %187, %193 : vector<2x128xf32>
    %195 = arith.addf %182, %194 : vector<2x128xf32>
    %c2_128 = arith.constant 2 : index
    %c1_129 = arith.constant 1 : index
    %196 = memref.load %arg16[%c2_128, %c1_129] : memref<3x5xf32, #tpu.memory_space<smem>>
    %197 = vector.broadcast %196 : f32 to vector<2x128xf32>
    %198 = arith.mulf %187, %197 : vector<2x128xf32>
    %199 = arith.addf %185, %198 : vector<2x128xf32>
    %c0_130 = arith.constant 0 : index
    %c2_131 = arith.constant 2 : index
    %c0_132 = arith.constant 0 : index
    %c0_133 = arith.constant 0 : index
    %200 = vector.load %arg12[%c0_130, %c2_131, %c0_132, %c0_133] : memref<1x3x2x128xf32, #tpu.memory_space<vmem>>, vector<1x1x2x128xf32>
    %201 = vector.shape_cast %200 : vector<1x1x2x128xf32> to vector<2x128xf32>
    %c0_134 = arith.constant 0 : index
    %c2_135 = arith.constant 2 : index
    %202 = memref.load %arg16[%c0_134, %c2_135] : memref<3x5xf32, #tpu.memory_space<smem>>
    %203 = vector.broadcast %202 : f32 to vector<2x128xf32>
    %204 = arith.mulf %201, %203 : vector<2x128xf32>
    %205 = arith.addf %191, %204 : vector<2x128xf32>
    %c1_136 = arith.constant 1 : index
    %c2_137 = arith.constant 2 : index
    %206 = memref.load %arg16[%c1_136, %c2_137] : memref<3x5xf32, #tpu.memory_space<smem>>
    %207 = vector.broadcast %206 : f32 to vector<2x128xf32>
    %208 = arith.mulf %201, %207 : vector<2x128xf32>
    %209 = arith.addf %195, %208 : vector<2x128xf32>
    %c2_138 = arith.constant 2 : index
    %c2_139 = arith.constant 2 : index
    %210 = memref.load %arg16[%c2_138, %c2_139] : memref<3x5xf32, #tpu.memory_space<smem>>
    %211 = vector.broadcast %210 : f32 to vector<2x128xf32>
    %212 = arith.mulf %201, %211 : vector<2x128xf32>
    %213 = arith.addf %199, %212 : vector<2x128xf32>
    %c0_140 = arith.constant 0 : index
    %c0_141 = arith.constant 0 : index
    %c0_142 = arith.constant 0 : index
    %c0_143 = arith.constant 0 : index
    %214 = vector.load %arg13[%c0_140, %c0_141, %c0_142, %c0_143] : memref<1x1x2x128xf32, #tpu.memory_space<vmem>>, vector<1x1x2x128xf32>
    %215 = vector.shape_cast %214 : vector<1x1x2x128xf32> to vector<2x128xf32>
    %c0_144 = arith.constant 0 : index
    %c3_145 = arith.constant 3 : index
    %216 = memref.load %arg16[%c0_144, %c3_145] : memref<3x5xf32, #tpu.memory_space<smem>>
    %217 = vector.broadcast %216 : f32 to vector<2x128xf32>
    %218 = arith.mulf %215, %217 : vector<2x128xf32>
    %219 = arith.addf %205, %218 : vector<2x128xf32>
    %c1_146 = arith.constant 1 : index
    %c3_147 = arith.constant 3 : index
    %220 = memref.load %arg16[%c1_146, %c3_147] : memref<3x5xf32, #tpu.memory_space<smem>>
    %221 = vector.broadcast %220 : f32 to vector<2x128xf32>
    %222 = arith.mulf %215, %221 : vector<2x128xf32>
    %223 = arith.addf %209, %222 : vector<2x128xf32>
    %c2_148 = arith.constant 2 : index
    %c3_149 = arith.constant 3 : index
    %224 = memref.load %arg16[%c2_148, %c3_149] : memref<3x5xf32, #tpu.memory_space<smem>>
    %225 = vector.broadcast %224 : f32 to vector<2x128xf32>
    %226 = arith.mulf %215, %225 : vector<2x128xf32>
    %227 = arith.addf %213, %226 : vector<2x128xf32>
    %c0_150 = arith.constant 0 : index
    %c0_151 = arith.constant 0 : index
    %c0_152 = arith.constant 0 : index
    %c0_153 = arith.constant 0 : index
    %228 = vector.load %arg14[%c0_150, %c0_151, %c0_152, %c0_153] : memref<1x1x2x128xf32, #tpu.memory_space<vmem>>, vector<1x1x2x128xf32>
    %229 = vector.shape_cast %228 : vector<1x1x2x128xf32> to vector<2x128xf32>
    %c0_154 = arith.constant 0 : index
    %c4_155 = arith.constant 4 : index
    %230 = memref.load %arg16[%c0_154, %c4_155] : memref<3x5xf32, #tpu.memory_space<smem>>
    %231 = vector.broadcast %230 : f32 to vector<2x128xf32>
    %232 = arith.mulf %229, %231 : vector<2x128xf32>
    %233 = arith.addf %219, %232 : vector<2x128xf32>
    %c1_156 = arith.constant 1 : index
    %c4_157 = arith.constant 4 : index
    %234 = memref.load %arg16[%c1_156, %c4_157] : memref<3x5xf32, #tpu.memory_space<smem>>
    %235 = vector.broadcast %234 : f32 to vector<2x128xf32>
    %236 = arith.mulf %229, %235 : vector<2x128xf32>
    %237 = arith.addf %223, %236 : vector<2x128xf32>
    %c2_158 = arith.constant 2 : index
    %c4_159 = arith.constant 4 : index
    %238 = memref.load %arg16[%c2_158, %c4_159] : memref<3x5xf32, #tpu.memory_space<smem>>
    %239 = vector.broadcast %238 : f32 to vector<2x128xf32>
    %240 = arith.mulf %229, %239 : vector<2x128xf32>
    %241 = arith.addf %227, %240 : vector<2x128xf32>
    %c0_160 = arith.constant 0 : index
    %242 = memref.load %arg17[%c0_160] : memref<3xf32, #tpu.memory_space<smem>>
    %243 = vector.broadcast %242 : f32 to vector<2x128xf32>
    %244 = arith.addf %233, %243 : vector<2x128xf32>
    %245 = math.tanh %244 : vector<2x128xf32>
    %c1_161 = arith.constant 1 : index
    %246 = memref.load %arg17[%c1_161] : memref<3xf32, #tpu.memory_space<smem>>
    %247 = vector.broadcast %246 : f32 to vector<2x128xf32>
    %248 = arith.addf %237, %247 : vector<2x128xf32>
    %249 = math.tanh %248 : vector<2x128xf32>
    %c2_162 = arith.constant 2 : index
    %250 = memref.load %arg17[%c2_162] : memref<3xf32, #tpu.memory_space<smem>>
    %251 = vector.broadcast %250 : f32 to vector<2x128xf32>
    %252 = arith.addf %241, %251 : vector<2x128xf32>
    %253 = math.tanh %252 : vector<2x128xf32>
    %c0_163 = arith.constant 0 : index
    %c0_164 = arith.constant 0 : index
    %254 = memref.load %arg18[%c0_163, %c0_164] : memref<3x6xf32, #tpu.memory_space<smem>>
    %255 = vector.broadcast %254 : f32 to vector<2x128xf32>
    %256 = arith.mulf %245, %255 : vector<2x128xf32>
    %c1_165 = arith.constant 1 : index
    %c0_166 = arith.constant 0 : index
    %257 = memref.load %arg18[%c1_165, %c0_166] : memref<3x6xf32, #tpu.memory_space<smem>>
    %258 = vector.broadcast %257 : f32 to vector<2x128xf32>
    %259 = arith.mulf %245, %258 : vector<2x128xf32>
    %c2_167 = arith.constant 2 : index
    %c0_168 = arith.constant 0 : index
    %260 = memref.load %arg18[%c2_167, %c0_168] : memref<3x6xf32, #tpu.memory_space<smem>>
    %261 = vector.broadcast %260 : f32 to vector<2x128xf32>
    %262 = arith.mulf %245, %261 : vector<2x128xf32>
    %c0_169 = arith.constant 0 : index
    %c1_170 = arith.constant 1 : index
    %263 = memref.load %arg18[%c0_169, %c1_170] : memref<3x6xf32, #tpu.memory_space<smem>>
    %264 = vector.broadcast %263 : f32 to vector<2x128xf32>
    %265 = arith.mulf %249, %264 : vector<2x128xf32>
    %266 = arith.addf %256, %265 : vector<2x128xf32>
    %c1_171 = arith.constant 1 : index
    %c1_172 = arith.constant 1 : index
    %267 = memref.load %arg18[%c1_171, %c1_172] : memref<3x6xf32, #tpu.memory_space<smem>>
    %268 = vector.broadcast %267 : f32 to vector<2x128xf32>
    %269 = arith.mulf %249, %268 : vector<2x128xf32>
    %270 = arith.addf %259, %269 : vector<2x128xf32>
    %c2_173 = arith.constant 2 : index
    %c1_174 = arith.constant 1 : index
    %271 = memref.load %arg18[%c2_173, %c1_174] : memref<3x6xf32, #tpu.memory_space<smem>>
    %272 = vector.broadcast %271 : f32 to vector<2x128xf32>
    %273 = arith.mulf %249, %272 : vector<2x128xf32>
    %274 = arith.addf %262, %273 : vector<2x128xf32>
    %c0_175 = arith.constant 0 : index
    %c2_176 = arith.constant 2 : index
    %275 = memref.load %arg18[%c0_175, %c2_176] : memref<3x6xf32, #tpu.memory_space<smem>>
    %276 = vector.broadcast %275 : f32 to vector<2x128xf32>
    %277 = arith.mulf %253, %276 : vector<2x128xf32>
    %278 = arith.addf %266, %277 : vector<2x128xf32>
    %c1_177 = arith.constant 1 : index
    %c2_178 = arith.constant 2 : index
    %279 = memref.load %arg18[%c1_177, %c2_178] : memref<3x6xf32, #tpu.memory_space<smem>>
    %280 = vector.broadcast %279 : f32 to vector<2x128xf32>
    %281 = arith.mulf %253, %280 : vector<2x128xf32>
    %282 = arith.addf %270, %281 : vector<2x128xf32>
    %c2_179 = arith.constant 2 : index
    %c2_180 = arith.constant 2 : index
    %283 = memref.load %arg18[%c2_179, %c2_180] : memref<3x6xf32, #tpu.memory_space<smem>>
    %284 = vector.broadcast %283 : f32 to vector<2x128xf32>
    %285 = arith.mulf %253, %284 : vector<2x128xf32>
    %286 = arith.addf %274, %285 : vector<2x128xf32>
    %c0_181 = arith.constant 0 : index
    %c0_182 = arith.constant 0 : index
    %c0_183 = arith.constant 0 : index
    %c0_184 = arith.constant 0 : index
    %287 = vector.load %arg15[%c0_181, %c0_182, %c0_183, %c0_184] : memref<1x3x2x128xf32, #tpu.memory_space<vmem>>, vector<1x1x2x128xf32>
    %288 = vector.shape_cast %287 : vector<1x1x2x128xf32> to vector<2x128xf32>
    %c0_185 = arith.constant 0 : index
    %c3_186 = arith.constant 3 : index
    %289 = memref.load %arg18[%c0_185, %c3_186] : memref<3x6xf32, #tpu.memory_space<smem>>
    %290 = vector.broadcast %289 : f32 to vector<2x128xf32>
    %291 = arith.mulf %288, %290 : vector<2x128xf32>
    %292 = arith.addf %278, %291 : vector<2x128xf32>
    %c1_187 = arith.constant 1 : index
    %c3_188 = arith.constant 3 : index
    %293 = memref.load %arg18[%c1_187, %c3_188] : memref<3x6xf32, #tpu.memory_space<smem>>
    %294 = vector.broadcast %293 : f32 to vector<2x128xf32>
    %295 = arith.mulf %288, %294 : vector<2x128xf32>
    %296 = arith.addf %282, %295 : vector<2x128xf32>
    %c2_189 = arith.constant 2 : index
    %c3_190 = arith.constant 3 : index
    %297 = memref.load %arg18[%c2_189, %c3_190] : memref<3x6xf32, #tpu.memory_space<smem>>
    %298 = vector.broadcast %297 : f32 to vector<2x128xf32>
    %299 = arith.mulf %288, %298 : vector<2x128xf32>
    %300 = arith.addf %286, %299 : vector<2x128xf32>
    %c0_191 = arith.constant 0 : index
    %c1_192 = arith.constant 1 : index
    %c0_193 = arith.constant 0 : index
    %c0_194 = arith.constant 0 : index
    %301 = vector.load %arg15[%c0_191, %c1_192, %c0_193, %c0_194] : memref<1x3x2x128xf32, #tpu.memory_space<vmem>>, vector<1x1x2x128xf32>
    %302 = vector.shape_cast %301 : vector<1x1x2x128xf32> to vector<2x128xf32>
    %c0_195 = arith.constant 0 : index
    %c4_196 = arith.constant 4 : index
    %303 = memref.load %arg18[%c0_195, %c4_196] : memref<3x6xf32, #tpu.memory_space<smem>>
    %304 = vector.broadcast %303 : f32 to vector<2x128xf32>
    %305 = arith.mulf %302, %304 : vector<2x128xf32>
    %306 = arith.addf %292, %305 : vector<2x128xf32>
    %c1_197 = arith.constant 1 : index
    %c4_198 = arith.constant 4 : index
    %307 = memref.load %arg18[%c1_197, %c4_198] : memref<3x6xf32, #tpu.memory_space<smem>>
    %308 = vector.broadcast %307 : f32 to vector<2x128xf32>
    %309 = arith.mulf %302, %308 : vector<2x128xf32>
    %310 = arith.addf %296, %309 : vector<2x128xf32>
    %c2_199 = arith.constant 2 : index
    %c4_200 = arith.constant 4 : index
    %311 = memref.load %arg18[%c2_199, %c4_200] : memref<3x6xf32, #tpu.memory_space<smem>>
    %312 = vector.broadcast %311 : f32 to vector<2x128xf32>
    %313 = arith.mulf %302, %312 : vector<2x128xf32>
    %314 = arith.addf %300, %313 : vector<2x128xf32>
    %c0_201 = arith.constant 0 : index
    %c2_202 = arith.constant 2 : index
    %c0_203 = arith.constant 0 : index
    %c0_204 = arith.constant 0 : index
    %315 = vector.load %arg15[%c0_201, %c2_202, %c0_203, %c0_204] : memref<1x3x2x128xf32, #tpu.memory_space<vmem>>, vector<1x1x2x128xf32>
    %316 = vector.shape_cast %315 : vector<1x1x2x128xf32> to vector<2x128xf32>
    %c0_205 = arith.constant 0 : index
    %c5_206 = arith.constant 5 : index
    %317 = memref.load %arg18[%c0_205, %c5_206] : memref<3x6xf32, #tpu.memory_space<smem>>
    %318 = vector.broadcast %317 : f32 to vector<2x128xf32>
    %319 = arith.mulf %316, %318 : vector<2x128xf32>
    %320 = arith.addf %306, %319 : vector<2x128xf32>
    %c1_207 = arith.constant 1 : index
    %c5_208 = arith.constant 5 : index
    %321 = memref.load %arg18[%c1_207, %c5_208] : memref<3x6xf32, #tpu.memory_space<smem>>
    %322 = vector.broadcast %321 : f32 to vector<2x128xf32>
    %323 = arith.mulf %316, %322 : vector<2x128xf32>
    %324 = arith.addf %310, %323 : vector<2x128xf32>
    %c2_209 = arith.constant 2 : index
    %c5_210 = arith.constant 5 : index
    %325 = memref.load %arg18[%c2_209, %c5_210] : memref<3x6xf32, #tpu.memory_space<smem>>
    %326 = vector.broadcast %325 : f32 to vector<2x128xf32>
    %327 = arith.mulf %316, %326 : vector<2x128xf32>
    %328 = arith.addf %314, %327 : vector<2x128xf32>
    %c0_211 = arith.constant 0 : index
    %329 = memref.load %arg19[%c0_211] : memref<3xf32, #tpu.memory_space<smem>>
    %330 = vector.broadcast %329 : f32 to vector<2x128xf32>
    %331 = arith.addf %320, %330 : vector<2x128xf32>
    %332 = math.tanh %331 : vector<2x128xf32>
    %c1_212 = arith.constant 1 : index
    %333 = memref.load %arg19[%c1_212] : memref<3xf32, #tpu.memory_space<smem>>
    %334 = vector.broadcast %333 : f32 to vector<2x128xf32>
    %335 = arith.addf %324, %334 : vector<2x128xf32>
    %336 = math.tanh %335 : vector<2x128xf32>
    %c2_213 = arith.constant 2 : index
    %337 = memref.load %arg19[%c2_213] : memref<3xf32, #tpu.memory_space<smem>>
    %338 = vector.broadcast %337 : f32 to vector<2x128xf32>
    %339 = arith.addf %328, %338 : vector<2x128xf32>
    %340 = math.tanh %339 : vector<2x128xf32>
    %c0_214 = arith.constant 0 : index
    %c3_215 = arith.constant 3 : index
    %c0_216 = arith.constant 0 : index
    %c0_217 = arith.constant 0 : index
    %341 = vector.load %arg24[%c0_214, %c3_215, %c0_216, %c0_217] : memref<1x12x2x128xf32, #tpu.memory_space<vmem>>, vector<1x1x2x128xf32>
    %342 = vector.shape_cast %341 : vector<1x1x2x128xf32> to vector<2x128xf32>
    %343 = vector.shape_cast %332 : vector<2x128xf32> to vector<1x1x2x128xf32>
    tpu.vector_store %arg24[%c0_214, %c3_215, %c0_216, %c0_217], %343 {strides = array<i32>} : memref<1x12x2x128xf32, #tpu.memory_space<vmem>>, vector<1x1x2x128xf32>,
    %c0_218 = arith.constant 0 : index
    %c4_219 = arith.constant 4 : index
    %c0_220 = arith.constant 0 : index
    %c0_221 = arith.constant 0 : index
    %344 = vector.load %arg24[%c0_218, %c4_219, %c0_220, %c0_221] : memref<1x12x2x128xf32, #tpu.memory_space<vmem>>, vector<1x1x2x128xf32>
    %345 = vector.shape_cast %344 : vector<1x1x2x128xf32> to vector<2x128xf32>
    %346 = vector.shape_cast %336 : vector<2x128xf32> to vector<1x1x2x128xf32>
    tpu.vector_store %arg24[%c0_218, %c4_219, %c0_220, %c0_221], %346 {strides = array<i32>} : memref<1x12x2x128xf32, #tpu.memory_space<vmem>>, vector<1x1x2x128xf32>,
    %c0_222 = arith.constant 0 : index
    %c5_223 = arith.constant 5 : index
    %c0_224 = arith.constant 0 : index
    %c0_225 = arith.constant 0 : index
    %347 = vector.load %arg24[%c0_222, %c5_223, %c0_224, %c0_225] : memref<1x12x2x128xf32, #tpu.memory_space<vmem>>, vector<1x1x2x128xf32>
    %348 = vector.shape_cast %347 : vector<1x1x2x128xf32> to vector<2x128xf32>
    %349 = vector.shape_cast %340 : vector<2x128xf32> to vector<1x1x2x128xf32>
    tpu.vector_store %arg24[%c0_222, %c5_223, %c0_224, %c0_225], %349 {strides = array<i32>} : memref<1x12x2x128xf32, #tpu.memory_space<vmem>>, vector<1x1x2x128xf32>,
    %c0_226 = arith.constant 0 : index
    %c0_227 = arith.constant 0 : index
    %c0_228 = arith.constant 0 : index
    %c0_229 = arith.constant 0 : index
    %350 = vector.load %arg2[%c0_226, %c0_227, %c0_228, %c0_229] : memref<1x3x2x128xf32, #tpu.memory_space<vmem>>, vector<1x1x2x128xf32>
    %351 = vector.shape_cast %350 : vector<1x1x2x128xf32> to vector<2x128xf32>
    %c0_230 = arith.constant 0 : index
    %c0_231 = arith.constant 0 : index
    %352 = memref.load %arg20[%c0_230, %c0_231] : memref<3x4xf32, #tpu.memory_space<smem>>
    %353 = vector.broadcast %352 : f32 to vector<2x128xf32>
    %354 = arith.mulf %351, %353 : vector<2x128xf32>
    %c1_232 = arith.constant 1 : index
    %c0_233 = arith.constant 0 : index
    %355 = memref.load %arg20[%c1_232, %c0_233] : memref<3x4xf32, #tpu.memory_space<smem>>
    %356 = vector.broadcast %355 : f32 to vector<2x128xf32>
    %357 = arith.mulf %351, %356 : vector<2x128xf32>
    %c2_234 = arith.constant 2 : index
    %c0_235 = arith.constant 0 : index
    %358 = memref.load %arg20[%c2_234, %c0_235] : memref<3x4xf32, #tpu.memory_space<smem>>
    %359 = vector.broadcast %358 : f32 to vector<2x128xf32>
    %360 = arith.mulf %351, %359 : vector<2x128xf32>
    %c0_236 = arith.constant 0 : index
    %c1_237 = arith.constant 1 : index
    %c0_238 = arith.constant 0 : index
    %c0_239 = arith.constant 0 : index
    %361 = vector.load %arg2[%c0_236, %c1_237, %c0_238, %c0_239] : memref<1x3x2x128xf32, #tpu.memory_space<vmem>>, vector<1x1x2x128xf32>
    %362 = vector.shape_cast %361 : vector<1x1x2x128xf32> to vector<2x128xf32>
    %c0_240 = arith.constant 0 : index
    %c1_241 = arith.constant 1 : index
    %363 = memref.load %arg20[%c0_240, %c1_241] : memref<3x4xf32, #tpu.memory_space<smem>>
    %364 = vector.broadcast %363 : f32 to vector<2x128xf32>
    %365 = arith.mulf %362, %364 : vector<2x128xf32>
    %366 = arith.addf %354, %365 : vector<2x128xf32>
    %c1_242 = arith.constant 1 : index
    %c1_243 = arith.constant 1 : index
    %367 = memref.load %arg20[%c1_242, %c1_243] : memref<3x4xf32, #tpu.memory_space<smem>>
    %368 = vector.broadcast %367 : f32 to vector<2x128xf32>
    %369 = arith.mulf %362, %368 : vector<2x128xf32>
    %370 = arith.addf %357, %369 : vector<2x128xf32>
    %c2_244 = arith.constant 2 : index
    %c1_245 = arith.constant 1 : index
    %371 = memref.load %arg20[%c2_244, %c1_245] : memref<3x4xf32, #tpu.memory_space<smem>>
    %372 = vector.broadcast %371 : f32 to vector<2x128xf32>
    %373 = arith.mulf %362, %372 : vector<2x128xf32>
    %374 = arith.addf %360, %373 : vector<2x128xf32>
    %c0_246 = arith.constant 0 : index
    %c2_247 = arith.constant 2 : index
    %c0_248 = arith.constant 0 : index
    %c0_249 = arith.constant 0 : index
    %375 = vector.load %arg2[%c0_246, %c2_247, %c0_248, %c0_249] : memref<1x3x2x128xf32, #tpu.memory_space<vmem>>, vector<1x1x2x128xf32>
    %376 = vector.shape_cast %375 : vector<1x1x2x128xf32> to vector<2x128xf32>
    %c0_250 = arith.constant 0 : index
    %c2_251 = arith.constant 2 : index
    %377 = memref.load %arg20[%c0_250, %c2_251] : memref<3x4xf32, #tpu.memory_space<smem>>
    %378 = vector.broadcast %377 : f32 to vector<2x128xf32>
    %379 = arith.mulf %376, %378 : vector<2x128xf32>
    %380 = arith.addf %366, %379 : vector<2x128xf32>
    %c1_252 = arith.constant 1 : index
    %c2_253 = arith.constant 2 : index
    %381 = memref.load %arg20[%c1_252, %c2_253] : memref<3x4xf32, #tpu.memory_space<smem>>
    %382 = vector.broadcast %381 : f32 to vector<2x128xf32>
    %383 = arith.mulf %376, %382 : vector<2x128xf32>
    %384 = arith.addf %370, %383 : vector<2x128xf32>
    %c2_254 = arith.constant 2 : index
    %c2_255 = arith.constant 2 : index
    %385 = memref.load %arg20[%c2_254, %c2_255] : memref<3x4xf32, #tpu.memory_space<smem>>
    %386 = vector.broadcast %385 : f32 to vector<2x128xf32>
    %387 = arith.mulf %376, %386 : vector<2x128xf32>
    %388 = arith.addf %374, %387 : vector<2x128xf32>
    %c0_256 = arith.constant 0 : index
    %c0_257 = arith.constant 0 : index
    %c0_258 = arith.constant 0 : index
    %c0_259 = arith.constant 0 : index
    %389 = vector.load %arg4[%c0_256, %c0_257, %c0_258, %c0_259] : memref<1x1x2x128xf32, #tpu.memory_space<vmem>>, vector<1x1x2x128xf32>
    %390 = vector.shape_cast %389 : vector<1x1x2x128xf32> to vector<2x128xf32>
    %c0_260 = arith.constant 0 : index
    %c3_261 = arith.constant 3 : index
    %391 = memref.load %arg20[%c0_260, %c3_261] : memref<3x4xf32, #tpu.memory_space<smem>>
    %392 = vector.broadcast %391 : f32 to vector<2x128xf32>
    %393 = arith.mulf %390, %392 : vector<2x128xf32>
    %394 = arith.addf %380, %393 : vector<2x128xf32>
    %c1_262 = arith.constant 1 : index
    %c3_263 = arith.constant 3 : index
    %395 = memref.load %arg20[%c1_262, %c3_263] : memref<3x4xf32, #tpu.memory_space<smem>>
    %396 = vector.broadcast %395 : f32 to vector<2x128xf32>
    %397 = arith.mulf %390, %396 : vector<2x128xf32>
    %398 = arith.addf %384, %397 : vector<2x128xf32>
    %c2_264 = arith.constant 2 : index
    %c3_265 = arith.constant 3 : index
    %399 = memref.load %arg20[%c2_264, %c3_265] : memref<3x4xf32, #tpu.memory_space<smem>>
    %400 = vector.broadcast %399 : f32 to vector<2x128xf32>
    %401 = arith.mulf %390, %400 : vector<2x128xf32>
    %402 = arith.addf %388, %401 : vector<2x128xf32>
    %c0_266 = arith.constant 0 : index
    %403 = memref.load %arg21[%c0_266] : memref<3xf32, #tpu.memory_space<smem>>
    %404 = vector.broadcast %403 : f32 to vector<2x128xf32>
    %405 = arith.addf %394, %404 : vector<2x128xf32>
    %406 = math.tanh %405 : vector<2x128xf32>
    %c1_267 = arith.constant 1 : index
    %407 = memref.load %arg21[%c1_267] : memref<3xf32, #tpu.memory_space<smem>>
    %408 = vector.broadcast %407 : f32 to vector<2x128xf32>
    %409 = arith.addf %398, %408 : vector<2x128xf32>
    %410 = math.tanh %409 : vector<2x128xf32>
    %c2_268 = arith.constant 2 : index
    %411 = memref.load %arg21[%c2_268] : memref<3xf32, #tpu.memory_space<smem>>
    %412 = vector.broadcast %411 : f32 to vector<2x128xf32>
    %413 = arith.addf %402, %412 : vector<2x128xf32>
    %414 = math.tanh %413 : vector<2x128xf32>
    %c0_269 = arith.constant 0 : index
    %c6 = arith.constant 6 : index
    %c0_270 = arith.constant 0 : index
    %c0_271 = arith.constant 0 : index
    %415 = vector.load %arg24[%c0_269, %c6, %c0_270, %c0_271] : memref<1x12x2x128xf32, #tpu.memory_space<vmem>>, vector<1x1x2x128xf32>
    %416 = vector.shape_cast %415 : vector<1x1x2x128xf32> to vector<2x128xf32>
    %417 = vector.shape_cast %406 : vector<2x128xf32> to vector<1x1x2x128xf32>
    tpu.vector_store %arg24[%c0_269, %c6, %c0_270, %c0_271], %417 {strides = array<i32>} : memref<1x12x2x128xf32, #tpu.memory_space<vmem>>, vector<1x1x2x128xf32>,
    %c0_272 = arith.constant 0 : index
    %c7 = arith.constant 7 : index
    %c0_273 = arith.constant 0 : index
    %c0_274 = arith.constant 0 : index
    %418 = vector.load %arg24[%c0_272, %c7, %c0_273, %c0_274] : memref<1x12x2x128xf32, #tpu.memory_space<vmem>>, vector<1x1x2x128xf32>
    %419 = vector.shape_cast %418 : vector<1x1x2x128xf32> to vector<2x128xf32>
    %420 = vector.shape_cast %410 : vector<2x128xf32> to vector<1x1x2x128xf32>
    tpu.vector_store %arg24[%c0_272, %c7, %c0_273, %c0_274], %420 {strides = array<i32>} : memref<1x12x2x128xf32, #tpu.memory_space<vmem>>, vector<1x1x2x128xf32>,
    %c0_275 = arith.constant 0 : index
    %c8 = arith.constant 8 : index
    %c0_276 = arith.constant 0 : index
    %c0_277 = arith.constant 0 : index
    %421 = vector.load %arg24[%c0_275, %c8, %c0_276, %c0_277] : memref<1x12x2x128xf32, #tpu.memory_space<vmem>>, vector<1x1x2x128xf32>
    %422 = vector.shape_cast %421 : vector<1x1x2x128xf32> to vector<2x128xf32>
    %423 = vector.shape_cast %414 : vector<2x128xf32> to vector<1x1x2x128xf32>
    tpu.vector_store %arg24[%c0_275, %c8, %c0_276, %c0_277], %423 {strides = array<i32>} : memref<1x12x2x128xf32, #tpu.memory_space<vmem>>, vector<1x1x2x128xf32>,
    %c0_278 = arith.constant 0 : index
    %c0_279 = arith.constant 0 : index
    %c0_280 = arith.constant 0 : index
    %c0_281 = arith.constant 0 : index
    %424 = vector.load %arg7[%c0_278, %c0_279, %c0_280, %c0_281] : memref<1x1x2x128xf32, #tpu.memory_space<vmem>>, vector<1x1x2x128xf32>
    %425 = vector.shape_cast %424 : vector<1x1x2x128xf32> to vector<2x128xf32>
    %c0_282 = arith.constant 0 : index
    %c0_283 = arith.constant 0 : index
    %c0_284 = arith.constant 0 : index
    %c0_285 = arith.constant 0 : index
    %426 = vector.load %arg2[%c0_282, %c0_283, %c0_284, %c0_285] : memref<1x3x2x128xf32, #tpu.memory_space<vmem>>, vector<1x1x2x128xf32>
    %427 = vector.shape_cast %426 : vector<1x1x2x128xf32> to vector<2x128xf32>
    %c0_286 = arith.constant 0 : index
    %c0_287 = arith.constant 0 : index
    %428 = memref.load %arg22[%c0_286, %c0_287] : memref<3x22xf32, #tpu.memory_space<smem>>
    %429 = vector.broadcast %428 : f32 to vector<2x128xf32>
    %430 = arith.mulf %427, %429 : vector<2x128xf32>
    %c1_288 = arith.constant 1 : index
    %c0_289 = arith.constant 0 : index
    %431 = memref.load %arg22[%c1_288, %c0_289] : memref<3x22xf32, #tpu.memory_space<smem>>
    %432 = vector.broadcast %431 : f32 to vector<2x128xf32>
    %433 = arith.mulf %427, %432 : vector<2x128xf32>
    %c2_290 = arith.constant 2 : index
    %c0_291 = arith.constant 0 : index
    %434 = memref.load %arg22[%c2_290, %c0_291] : memref<3x22xf32, #tpu.memory_space<smem>>
    %435 = vector.broadcast %434 : f32 to vector<2x128xf32>
    %436 = arith.mulf %427, %435 : vector<2x128xf32>
    %c0_292 = arith.constant 0 : index
    %c1_293 = arith.constant 1 : index
    %c0_294 = arith.constant 0 : index
    %c0_295 = arith.constant 0 : index
    %437 = vector.load %arg2[%c0_292, %c1_293, %c0_294, %c0_295] : memref<1x3x2x128xf32, #tpu.memory_space<vmem>>, vector<1x1x2x128xf32>
    %438 = vector.shape_cast %437 : vector<1x1x2x128xf32> to vector<2x128xf32>
    %c0_296 = arith.constant 0 : index
    %c1_297 = arith.constant 1 : index
    %439 = memref.load %arg22[%c0_296, %c1_297] : memref<3x22xf32, #tpu.memory_space<smem>>
    %440 = vector.broadcast %439 : f32 to vector<2x128xf32>
    %441 = arith.mulf %438, %440 : vector<2x128xf32>
    %442 = arith.addf %430, %441 : vector<2x128xf32>
    %c1_298 = arith.constant 1 : index
    %c1_299 = arith.constant 1 : index
    %443 = memref.load %arg22[%c1_298, %c1_299] : memref<3x22xf32, #tpu.memory_space<smem>>
    %444 = vector.broadcast %443 : f32 to vector<2x128xf32>
    %445 = arith.mulf %438, %444 : vector<2x128xf32>
    %446 = arith.addf %433, %445 : vector<2x128xf32>
    %c2_300 = arith.constant 2 : index
    %c1_301 = arith.constant 1 : index
    %447 = memref.load %arg22[%c2_300, %c1_301] : memref<3x22xf32, #tpu.memory_space<smem>>
    %448 = vector.broadcast %447 : f32 to vector<2x128xf32>
    %449 = arith.mulf %438, %448 : vector<2x128xf32>
    %450 = arith.addf %436, %449 : vector<2x128xf32>
    %c0_302 = arith.constant 0 : index
    %c2_303 = arith.constant 2 : index
    %c0_304 = arith.constant 0 : index
    %c0_305 = arith.constant 0 : index
    %451 = vector.load %arg2[%c0_302, %c2_303, %c0_304, %c0_305] : memref<1x3x2x128xf32, #tpu.memory_space<vmem>>, vector<1x1x2x128xf32>
    %452 = vector.shape_cast %451 : vector<1x1x2x128xf32> to vector<2x128xf32>
    %c0_306 = arith.constant 0 : index
    %c2_307 = arith.constant 2 : index
    %453 = memref.load %arg22[%c0_306, %c2_307] : memref<3x22xf32, #tpu.memory_space<smem>>
    %454 = vector.broadcast %453 : f32 to vector<2x128xf32>
    %455 = arith.mulf %452, %454 : vector<2x128xf32>
    %456 = arith.addf %442, %455 : vector<2x128xf32>
    %c1_308 = arith.constant 1 : index
    %c2_309 = arith.constant 2 : index
    %457 = memref.load %arg22[%c1_308, %c2_309] : memref<3x22xf32, #tpu.memory_space<smem>>
    %458 = vector.broadcast %457 : f32 to vector<2x128xf32>
    %459 = arith.mulf %452, %458 : vector<2x128xf32>
    %460 = arith.addf %446, %459 : vector<2x128xf32>
    %c2_310 = arith.constant 2 : index
    %c2_311 = arith.constant 2 : index
    %461 = memref.load %arg22[%c2_310, %c2_311] : memref<3x22xf32, #tpu.memory_space<smem>>
    %462 = vector.broadcast %461 : f32 to vector<2x128xf32>
    %463 = arith.mulf %452, %462 : vector<2x128xf32>
    %464 = arith.addf %450, %463 : vector<2x128xf32>
    %c0_312 = arith.constant 0 : index
    %c0_313 = arith.constant 0 : index
    %c0_314 = arith.constant 0 : index
    %c0_315 = arith.constant 0 : index
    %465 = vector.load %arg5[%c0_312, %c0_313, %c0_314, %c0_315] : memref<1x8x2x128xf32, #tpu.memory_space<vmem>>, vector<1x1x2x128xf32>
    %466 = vector.shape_cast %465 : vector<1x1x2x128xf32> to vector<2x128xf32>
    %467 = arith.mulf %466, %425 : vector<2x128xf32>
    %c0_316 = arith.constant 0 : index
    %c3_317 = arith.constant 3 : index
    %468 = memref.load %arg22[%c0_316, %c3_317] : memref<3x22xf32, #tpu.memory_space<smem>>
    %469 = vector.broadcast %468 : f32 to vector<2x128xf32>
    %470 = arith.mulf %467, %469 : vector<2x128xf32>
    %471 = arith.addf %456, %470 : vector<2x128xf32>
    %c1_318 = arith.constant 1 : index
    %c3_319 = arith.constant 3 : index
    %472 = memref.load %arg22[%c1_318, %c3_319] : memref<3x22xf32, #tpu.memory_space<smem>>
    %473 = vector.broadcast %472 : f32 to vector<2x128xf32>
    %474 = arith.mulf %467, %473 : vector<2x128xf32>
    %475 = arith.addf %460, %474 : vector<2x128xf32>
    %c2_320 = arith.constant 2 : index
    %c3_321 = arith.constant 3 : index
    %476 = memref.load %arg22[%c2_320, %c3_321] : memref<3x22xf32, #tpu.memory_space<smem>>
    %477 = vector.broadcast %476 : f32 to vector<2x128xf32>
    %478 = arith.mulf %467, %477 : vector<2x128xf32>
    %479 = arith.addf %464, %478 : vector<2x128xf32>
    %c0_322 = arith.constant 0 : index
    %c1_323 = arith.constant 1 : index
    %c0_324 = arith.constant 0 : index
    %c0_325 = arith.constant 0 : index
    %480 = vector.load %arg5[%c0_322, %c1_323, %c0_324, %c0_325] : memref<1x8x2x128xf32, #tpu.memory_space<vmem>>, vector<1x1x2x128xf32>
    %481 = vector.shape_cast %480 : vector<1x1x2x128xf32> to vector<2x128xf32>
    %482 = arith.mulf %481, %425 : vector<2x128xf32>
    %c0_326 = arith.constant 0 : index
    %c4_327 = arith.constant 4 : index
    %483 = memref.load %arg22[%c0_326, %c4_327] : memref<3x22xf32, #tpu.memory_space<smem>>
    %484 = vector.broadcast %483 : f32 to vector<2x128xf32>
    %485 = arith.mulf %482, %484 : vector<2x128xf32>
    %486 = arith.addf %471, %485 : vector<2x128xf32>
    %c1_328 = arith.constant 1 : index
    %c4_329 = arith.constant 4 : index
    %487 = memref.load %arg22[%c1_328, %c4_329] : memref<3x22xf32, #tpu.memory_space<smem>>
    %488 = vector.broadcast %487 : f32 to vector<2x128xf32>
    %489 = arith.mulf %482, %488 : vector<2x128xf32>
    %490 = arith.addf %475, %489 : vector<2x128xf32>
    %c2_330 = arith.constant 2 : index
    %c4_331 = arith.constant 4 : index
    %491 = memref.load %arg22[%c2_330, %c4_331] : memref<3x22xf32, #tpu.memory_space<smem>>
    %492 = vector.broadcast %491 : f32 to vector<2x128xf32>
    %493 = arith.mulf %482, %492 : vector<2x128xf32>
    %494 = arith.addf %479, %493 : vector<2x128xf32>
    %c0_332 = arith.constant 0 : index
    %c2_333 = arith.constant 2 : index
    %c0_334 = arith.constant 0 : index
    %c0_335 = arith.constant 0 : index
    %495 = vector.load %arg5[%c0_332, %c2_333, %c0_334, %c0_335] : memref<1x8x2x128xf32, #tpu.memory_space<vmem>>, vector<1x1x2x128xf32>
    %496 = vector.shape_cast %495 : vector<1x1x2x128xf32> to vector<2x128xf32>
    %497 = arith.mulf %496, %425 : vector<2x128xf32>
    %c0_336 = arith.constant 0 : index
    %c5_337 = arith.constant 5 : index
    %498 = memref.load %arg22[%c0_336, %c5_337] : memref<3x22xf32, #tpu.memory_space<smem>>
    %499 = vector.broadcast %498 : f32 to vector<2x128xf32>
    %500 = arith.mulf %497, %499 : vector<2x128xf32>
    %501 = arith.addf %486, %500 : vector<2x128xf32>
    %c1_338 = arith.constant 1 : index
    %c5_339 = arith.constant 5 : index
    %502 = memref.load %arg22[%c1_338, %c5_339] : memref<3x22xf32, #tpu.memory_space<smem>>
    %503 = vector.broadcast %502 : f32 to vector<2x128xf32>
    %504 = arith.mulf %497, %503 : vector<2x128xf32>
    %505 = arith.addf %490, %504 : vector<2x128xf32>
    %c2_340 = arith.constant 2 : index
    %c5_341 = arith.constant 5 : index
    %506 = memref.load %arg22[%c2_340, %c5_341] : memref<3x22xf32, #tpu.memory_space<smem>>
    %507 = vector.broadcast %506 : f32 to vector<2x128xf32>
    %508 = arith.mulf %497, %507 : vector<2x128xf32>
    %509 = arith.addf %494, %508 : vector<2x128xf32>
    %c0_342 = arith.constant 0 : index
    %c3_343 = arith.constant 3 : index
    %c0_344 = arith.constant 0 : index
    %c0_345 = arith.constant 0 : index
    %510 = vector.load %arg5[%c0_342, %c3_343, %c0_344, %c0_345] : memref<1x8x2x128xf32, #tpu.memory_space<vmem>>, vector<1x1x2x128xf32>
    %511 = vector.shape_cast %510 : vector<1x1x2x128xf32> to vector<2x128xf32>
    %512 = arith.mulf %511, %425 : vector<2x128xf32>
    %c0_346 = arith.constant 0 : index
    %c6_347 = arith.constant 6 : index
    %513 = memref.load %arg22[%c0_346, %c6_347] : memref<3x22xf32, #tpu.memory_space<smem>>
    %514 = vector.broadcast %513 : f32 to vector<2x128xf32>
    %515 = arith.mulf %512, %514 : vector<2x128xf32>
    %516 = arith.addf %501, %515 : vector<2x128xf32>
    %c1_348 = arith.constant 1 : index
    %c6_349 = arith.constant 6 : index
    %517 = memref.load %arg22[%c1_348, %c6_349] : memref<3x22xf32, #tpu.memory_space<smem>>
    %518 = vector.broadcast %517 : f32 to vector<2x128xf32>
    %519 = arith.mulf %512, %518 : vector<2x128xf32>
    %520 = arith.addf %505, %519 : vector<2x128xf32>
    %c2_350 = arith.constant 2 : index
    %c6_351 = arith.constant 6 : index
    %521 = memref.load %arg22[%c2_350, %c6_351] : memref<3x22xf32, #tpu.memory_space<smem>>
    %522 = vector.broadcast %521 : f32 to vector<2x128xf32>
    %523 = arith.mulf %512, %522 : vector<2x128xf32>
    %524 = arith.addf %509, %523 : vector<2x128xf32>
    %c0_352 = arith.constant 0 : index
    %c4_353 = arith.constant 4 : index
    %c0_354 = arith.constant 0 : index
    %c0_355 = arith.constant 0 : index
    %525 = vector.load %arg5[%c0_352, %c4_353, %c0_354, %c0_355] : memref<1x8x2x128xf32, #tpu.memory_space<vmem>>, vector<1x1x2x128xf32>
    %526 = vector.shape_cast %525 : vector<1x1x2x128xf32> to vector<2x128xf32>
    %527 = arith.mulf %526, %425 : vector<2x128xf32>
    %c0_356 = arith.constant 0 : index
    %c7_357 = arith.constant 7 : index
    %528 = memref.load %arg22[%c0_356, %c7_357] : memref<3x22xf32, #tpu.memory_space<smem>>
    %529 = vector.broadcast %528 : f32 to vector<2x128xf32>
    %530 = arith.mulf %527, %529 : vector<2x128xf32>
    %531 = arith.addf %516, %530 : vector<2x128xf32>
    %c1_358 = arith.constant 1 : index
    %c7_359 = arith.constant 7 : index
    %532 = memref.load %arg22[%c1_358, %c7_359] : memref<3x22xf32, #tpu.memory_space<smem>>
    %533 = vector.broadcast %532 : f32 to vector<2x128xf32>
    %534 = arith.mulf %527, %533 : vector<2x128xf32>
    %535 = arith.addf %520, %534 : vector<2x128xf32>
    %c2_360 = arith.constant 2 : index
    %c7_361 = arith.constant 7 : index
    %536 = memref.load %arg22[%c2_360, %c7_361] : memref<3x22xf32, #tpu.memory_space<smem>>
    %537 = vector.broadcast %536 : f32 to vector<2x128xf32>
    %538 = arith.mulf %527, %537 : vector<2x128xf32>
    %539 = arith.addf %524, %538 : vector<2x128xf32>
    %c0_362 = arith.constant 0 : index
    %c5_363 = arith.constant 5 : index
    %c0_364 = arith.constant 0 : index
    %c0_365 = arith.constant 0 : index
    %540 = vector.load %arg5[%c0_362, %c5_363, %c0_364, %c0_365] : memref<1x8x2x128xf32, #tpu.memory_space<vmem>>, vector<1x1x2x128xf32>
    %541 = vector.shape_cast %540 : vector<1x1x2x128xf32> to vector<2x128xf32>
    %542 = arith.mulf %541, %425 : vector<2x128xf32>
    %c0_366 = arith.constant 0 : index
    %c8_367 = arith.constant 8 : index
    %543 = memref.load %arg22[%c0_366, %c8_367] : memref<3x22xf32, #tpu.memory_space<smem>>
    %544 = vector.broadcast %543 : f32 to vector<2x128xf32>
    %545 = arith.mulf %542, %544 : vector<2x128xf32>
    %546 = arith.addf %531, %545 : vector<2x128xf32>
    %c1_368 = arith.constant 1 : index
    %c8_369 = arith.constant 8 : index
    %547 = memref.load %arg22[%c1_368, %c8_369] : memref<3x22xf32, #tpu.memory_space<smem>>
    %548 = vector.broadcast %547 : f32 to vector<2x128xf32>
    %549 = arith.mulf %542, %548 : vector<2x128xf32>
    %550 = arith.addf %535, %549 : vector<2x128xf32>
    %c2_370 = arith.constant 2 : index
    %c8_371 = arith.constant 8 : index
    %551 = memref.load %arg22[%c2_370, %c8_371] : memref<3x22xf32, #tpu.memory_space<smem>>
    %552 = vector.broadcast %551 : f32 to vector<2x128xf32>
    %553 = arith.mulf %542, %552 : vector<2x128xf32>
    %554 = arith.addf %539, %553 : vector<2x128xf32>
    %c0_372 = arith.constant 0 : index
    %c6_373 = arith.constant 6 : index
    %c0_374 = arith.constant 0 : index
    %c0_375 = arith.constant 0 : index
    %555 = vector.load %arg5[%c0_372, %c6_373, %c0_374, %c0_375] : memref<1x8x2x128xf32, #tpu.memory_space<vmem>>, vector<1x1x2x128xf32>
    %556 = vector.shape_cast %555 : vector<1x1x2x128xf32> to vector<2x128xf32>
    %557 = arith.mulf %556, %425 : vector<2x128xf32>
    %c0_376 = arith.constant 0 : index
    %c9 = arith.constant 9 : index
    %558 = memref.load %arg22[%c0_376, %c9] : memref<3x22xf32, #tpu.memory_space<smem>>
    %559 = vector.broadcast %558 : f32 to vector<2x128xf32>
    %560 = arith.mulf %557, %559 : vector<2x128xf32>
    %561 = arith.addf %546, %560 : vector<2x128xf32>
    %c1_377 = arith.constant 1 : index
    %c9_378 = arith.constant 9 : index
    %562 = memref.load %arg22[%c1_377, %c9_378] : memref<3x22xf32, #tpu.memory_space<smem>>
    %563 = vector.broadcast %562 : f32 to vector<2x128xf32>
    %564 = arith.mulf %557, %563 : vector<2x128xf32>
    %565 = arith.addf %550, %564 : vector<2x128xf32>
    %c2_379 = arith.constant 2 : index
    %c9_380 = arith.constant 9 : index
    %566 = memref.load %arg22[%c2_379, %c9_380] : memref<3x22xf32, #tpu.memory_space<smem>>
    %567 = vector.broadcast %566 : f32 to vector<2x128xf32>
    %568 = arith.mulf %557, %567 : vector<2x128xf32>
    %569 = arith.addf %554, %568 : vector<2x128xf32>
    %c0_381 = arith.constant 0 : index
    %c7_382 = arith.constant 7 : index
    %c0_383 = arith.constant 0 : index
    %c0_384 = arith.constant 0 : index
    %570 = vector.load %arg5[%c0_381, %c7_382, %c0_383, %c0_384] : memref<1x8x2x128xf32, #tpu.memory_space<vmem>>, vector<1x1x2x128xf32>
    %571 = vector.shape_cast %570 : vector<1x1x2x128xf32> to vector<2x128xf32>
    %572 = arith.mulf %571, %425 : vector<2x128xf32>
    %c0_385 = arith.constant 0 : index
    %c10 = arith.constant 10 : index
    %573 = memref.load %arg22[%c0_385, %c10] : memref<3x22xf32, #tpu.memory_space<smem>>
    %574 = vector.broadcast %573 : f32 to vector<2x128xf32>
    %575 = arith.mulf %572, %574 : vector<2x128xf32>
    %576 = arith.addf %561, %575 : vector<2x128xf32>
    %c1_386 = arith.constant 1 : index
    %c10_387 = arith.constant 10 : index
    %577 = memref.load %arg22[%c1_386, %c10_387] : memref<3x22xf32, #tpu.memory_space<smem>>
    %578 = vector.broadcast %577 : f32 to vector<2x128xf32>
    %579 = arith.mulf %572, %578 : vector<2x128xf32>
    %580 = arith.addf %565, %579 : vector<2x128xf32>
    %c2_388 = arith.constant 2 : index
    %c10_389 = arith.constant 10 : index
    %581 = memref.load %arg22[%c2_388, %c10_389] : memref<3x22xf32, #tpu.memory_space<smem>>
    %582 = vector.broadcast %581 : f32 to vector<2x128xf32>
    %583 = arith.mulf %572, %582 : vector<2x128xf32>
    %584 = arith.addf %569, %583 : vector<2x128xf32>
    %c0_390 = arith.constant 0 : index
    %c0_391 = arith.constant 0 : index
    %c0_392 = arith.constant 0 : index
    %c0_393 = arith.constant 0 : index
    %585 = vector.load %arg3[%c0_390, %c0_391, %c0_392, %c0_393] : memref<1x1x2x128xf32, #tpu.memory_space<vmem>>, vector<1x1x2x128xf32>
    %586 = vector.shape_cast %585 : vector<1x1x2x128xf32> to vector<2x128xf32>
    %c0_394 = arith.constant 0 : index
    %c11 = arith.constant 11 : index
    %587 = memref.load %arg22[%c0_394, %c11] : memref<3x22xf32, #tpu.memory_space<smem>>
    %588 = vector.broadcast %587 : f32 to vector<2x128xf32>
    %589 = arith.mulf %586, %588 : vector<2x128xf32>
    %590 = arith.addf %576, %589 : vector<2x128xf32>
    %c1_395 = arith.constant 1 : index
    %c11_396 = arith.constant 11 : index
    %591 = memref.load %arg22[%c1_395, %c11_396] : memref<3x22xf32, #tpu.memory_space<smem>>
    %592 = vector.broadcast %591 : f32 to vector<2x128xf32>
    %593 = arith.mulf %586, %592 : vector<2x128xf32>
    %594 = arith.addf %580, %593 : vector<2x128xf32>
    %c2_397 = arith.constant 2 : index
    %c11_398 = arith.constant 11 : index
    %595 = memref.load %arg22[%c2_397, %c11_398] : memref<3x22xf32, #tpu.memory_space<smem>>
    %596 = vector.broadcast %595 : f32 to vector<2x128xf32>
    %597 = arith.mulf %586, %596 : vector<2x128xf32>
    %598 = arith.addf %584, %597 : vector<2x128xf32>
    %c0_399 = arith.constant 0 : index
    %c0_400 = arith.constant 0 : index
    %c0_401 = arith.constant 0 : index
    %c0_402 = arith.constant 0 : index
    %599 = vector.load %arg6[%c0_399, %c0_400, %c0_401, %c0_402] : memref<1x8x2x128xf32, #tpu.memory_space<vmem>>, vector<1x1x2x128xf32>
    %600 = vector.shape_cast %599 : vector<1x1x2x128xf32> to vector<2x128xf32>
    %c0_403 = arith.constant 0 : index
    %c12 = arith.constant 12 : index
    %601 = memref.load %arg22[%c0_403, %c12] : memref<3x22xf32, #tpu.memory_space<smem>>
    %602 = vector.broadcast %601 : f32 to vector<2x128xf32>
    %603 = arith.mulf %600, %602 : vector<2x128xf32>
    %604 = arith.addf %590, %603 : vector<2x128xf32>
    %c1_404 = arith.constant 1 : index
    %c12_405 = arith.constant 12 : index
    %605 = memref.load %arg22[%c1_404, %c12_405] : memref<3x22xf32, #tpu.memory_space<smem>>
    %606 = vector.broadcast %605 : f32 to vector<2x128xf32>
    %607 = arith.mulf %600, %606 : vector<2x128xf32>
    %608 = arith.addf %594, %607 : vector<2x128xf32>
    %c2_406 = arith.constant 2 : index
    %c12_407 = arith.constant 12 : index
    %609 = memref.load %arg22[%c2_406, %c12_407] : memref<3x22xf32, #tpu.memory_space<smem>>
    %610 = vector.broadcast %609 : f32 to vector<2x128xf32>
    %611 = arith.mulf %600, %610 : vector<2x128xf32>
    %612 = arith.addf %598, %611 : vector<2x128xf32>
    %c0_408 = arith.constant 0 : index
    %c1_409 = arith.constant 1 : index
    %c0_410 = arith.constant 0 : index
    %c0_411 = arith.constant 0 : index
    %613 = vector.load %arg6[%c0_408, %c1_409, %c0_410, %c0_411] : memref<1x8x2x128xf32, #tpu.memory_space<vmem>>, vector<1x1x2x128xf32>
    %614 = vector.shape_cast %613 : vector<1x1x2x128xf32> to vector<2x128xf32>
    %c0_412 = arith.constant 0 : index
    %c13 = arith.constant 13 : index
    %615 = memref.load %arg22[%c0_412, %c13] : memref<3x22xf32, #tpu.memory_space<smem>>
    %616 = vector.broadcast %615 : f32 to vector<2x128xf32>
    %617 = arith.mulf %614, %616 : vector<2x128xf32>
    %618 = arith.addf %604, %617 : vector<2x128xf32>
    %c1_413 = arith.constant 1 : index
    %c13_414 = arith.constant 13 : index
    %619 = memref.load %arg22[%c1_413, %c13_414] : memref<3x22xf32, #tpu.memory_space<smem>>
    %620 = vector.broadcast %619 : f32 to vector<2x128xf32>
    %621 = arith.mulf %614, %620 : vector<2x128xf32>
    %622 = arith.addf %608, %621 : vector<2x128xf32>
    %c2_415 = arith.constant 2 : index
    %c13_416 = arith.constant 13 : index
    %623 = memref.load %arg22[%c2_415, %c13_416] : memref<3x22xf32, #tpu.memory_space<smem>>
    %624 = vector.broadcast %623 : f32 to vector<2x128xf32>
    %625 = arith.mulf %614, %624 : vector<2x128xf32>
    %626 = arith.addf %612, %625 : vector<2x128xf32>
    %c0_417 = arith.constant 0 : index
    %c2_418 = arith.constant 2 : index
    %c0_419 = arith.constant 0 : index
    %c0_420 = arith.constant 0 : index
    %627 = vector.load %arg6[%c0_417, %c2_418, %c0_419, %c0_420] : memref<1x8x2x128xf32, #tpu.memory_space<vmem>>, vector<1x1x2x128xf32>
    %628 = vector.shape_cast %627 : vector<1x1x2x128xf32> to vector<2x128xf32>
    %c0_421 = arith.constant 0 : index
    %c14 = arith.constant 14 : index
    %629 = memref.load %arg22[%c0_421, %c14] : memref<3x22xf32, #tpu.memory_space<smem>>
    %630 = vector.broadcast %629 : f32 to vector<2x128xf32>
    %631 = arith.mulf %628, %630 : vector<2x128xf32>
    %632 = arith.addf %618, %631 : vector<2x128xf32>
    %c1_422 = arith.constant 1 : index
    %c14_423 = arith.constant 14 : index
    %633 = memref.load %arg22[%c1_422, %c14_423] : memref<3x22xf32, #tpu.memory_space<smem>>
    %634 = vector.broadcast %633 : f32 to vector<2x128xf32>
    %635 = arith.mulf %628, %634 : vector<2x128xf32>
    %636 = arith.addf %622, %635 : vector<2x128xf32>
    %c2_424 = arith.constant 2 : index
    %c14_425 = arith.constant 14 : index
    %637 = memref.load %arg22[%c2_424, %c14_425] : memref<3x22xf32, #tpu.memory_space<smem>>
    %638 = vector.broadcast %637 : f32 to vector<2x128xf32>
    %639 = arith.mulf %628, %638 : vector<2x128xf32>
    %640 = arith.addf %626, %639 : vector<2x128xf32>
    %c0_426 = arith.constant 0 : index
    %c3_427 = arith.constant 3 : index
    %c0_428 = arith.constant 0 : index
    %c0_429 = arith.constant 0 : index
    %641 = vector.load %arg6[%c0_426, %c3_427, %c0_428, %c0_429] : memref<1x8x2x128xf32, #tpu.memory_space<vmem>>, vector<1x1x2x128xf32>
    %642 = vector.shape_cast %641 : vector<1x1x2x128xf32> to vector<2x128xf32>
    %c0_430 = arith.constant 0 : index
    %c15 = arith.constant 15 : index
    %643 = memref.load %arg22[%c0_430, %c15] : memref<3x22xf32, #tpu.memory_space<smem>>
    %644 = vector.broadcast %643 : f32 to vector<2x128xf32>
    %645 = arith.mulf %642, %644 : vector<2x128xf32>
    %646 = arith.addf %632, %645 : vector<2x128xf32>
    %c1_431 = arith.constant 1 : index
    %c15_432 = arith.constant 15 : index
    %647 = memref.load %arg22[%c1_431, %c15_432] : memref<3x22xf32, #tpu.memory_space<smem>>
    %648 = vector.broadcast %647 : f32 to vector<2x128xf32>
    %649 = arith.mulf %642, %648 : vector<2x128xf32>
    %650 = arith.addf %636, %649 : vector<2x128xf32>
    %c2_433 = arith.constant 2 : index
    %c15_434 = arith.constant 15 : index
    %651 = memref.load %arg22[%c2_433, %c15_434] : memref<3x22xf32, #tpu.memory_space<smem>>
    %652 = vector.broadcast %651 : f32 to vector<2x128xf32>
    %653 = arith.mulf %642, %652 : vector<2x128xf32>
    %654 = arith.addf %640, %653 : vector<2x128xf32>
    %c0_435 = arith.constant 0 : index
    %c4_436 = arith.constant 4 : index
    %c0_437 = arith.constant 0 : index
    %c0_438 = arith.constant 0 : index
    %655 = vector.load %arg6[%c0_435, %c4_436, %c0_437, %c0_438] : memref<1x8x2x128xf32, #tpu.memory_space<vmem>>, vector<1x1x2x128xf32>
    %656 = vector.shape_cast %655 : vector<1x1x2x128xf32> to vector<2x128xf32>
    %c0_439 = arith.constant 0 : index
    %c16 = arith.constant 16 : index
    %657 = memref.load %arg22[%c0_439, %c16] : memref<3x22xf32, #tpu.memory_space<smem>>
    %658 = vector.broadcast %657 : f32 to vector<2x128xf32>
    %659 = arith.mulf %656, %658 : vector<2x128xf32>
    %660 = arith.addf %646, %659 : vector<2x128xf32>
    %c1_440 = arith.constant 1 : index
    %c16_441 = arith.constant 16 : index
    %661 = memref.load %arg22[%c1_440, %c16_441] : memref<3x22xf32, #tpu.memory_space<smem>>
    %662 = vector.broadcast %661 : f32 to vector<2x128xf32>
    %663 = arith.mulf %656, %662 : vector<2x128xf32>
    %664 = arith.addf %650, %663 : vector<2x128xf32>
    %c2_442 = arith.constant 2 : index
    %c16_443 = arith.constant 16 : index
    %665 = memref.load %arg22[%c2_442, %c16_443] : memref<3x22xf32, #tpu.memory_space<smem>>
    %666 = vector.broadcast %665 : f32 to vector<2x128xf32>
    %667 = arith.mulf %656, %666 : vector<2x128xf32>
    %668 = arith.addf %654, %667 : vector<2x128xf32>
    %c0_444 = arith.constant 0 : index
    %c5_445 = arith.constant 5 : index
    %c0_446 = arith.constant 0 : index
    %c0_447 = arith.constant 0 : index
    %669 = vector.load %arg6[%c0_444, %c5_445, %c0_446, %c0_447] : memref<1x8x2x128xf32, #tpu.memory_space<vmem>>, vector<1x1x2x128xf32>
    %670 = vector.shape_cast %669 : vector<1x1x2x128xf32> to vector<2x128xf32>
    %c0_448 = arith.constant 0 : index
    %c17 = arith.constant 17 : index
    %671 = memref.load %arg22[%c0_448, %c17] : memref<3x22xf32, #tpu.memory_space<smem>>
    %672 = vector.broadcast %671 : f32 to vector<2x128xf32>
    %673 = arith.mulf %670, %672 : vector<2x128xf32>
    %674 = arith.addf %660, %673 : vector<2x128xf32>
    %c1_449 = arith.constant 1 : index
    %c17_450 = arith.constant 17 : index
    %675 = memref.load %arg22[%c1_449, %c17_450] : memref<3x22xf32, #tpu.memory_space<smem>>
    %676 = vector.broadcast %675 : f32 to vector<2x128xf32>
    %677 = arith.mulf %670, %676 : vector<2x128xf32>
    %678 = arith.addf %664, %677 : vector<2x128xf32>
    %c2_451 = arith.constant 2 : index
    %c17_452 = arith.constant 17 : index
    %679 = memref.load %arg22[%c2_451, %c17_452] : memref<3x22xf32, #tpu.memory_space<smem>>
    %680 = vector.broadcast %679 : f32 to vector<2x128xf32>
    %681 = arith.mulf %670, %680 : vector<2x128xf32>
    %682 = arith.addf %668, %681 : vector<2x128xf32>
    %c0_453 = arith.constant 0 : index
    %c6_454 = arith.constant 6 : index
    %c0_455 = arith.constant 0 : index
    %c0_456 = arith.constant 0 : index
    %683 = vector.load %arg6[%c0_453, %c6_454, %c0_455, %c0_456] : memref<1x8x2x128xf32, #tpu.memory_space<vmem>>, vector<1x1x2x128xf32>
    %684 = vector.shape_cast %683 : vector<1x1x2x128xf32> to vector<2x128xf32>
    %c0_457 = arith.constant 0 : index
    %c18 = arith.constant 18 : index
    %685 = memref.load %arg22[%c0_457, %c18] : memref<3x22xf32, #tpu.memory_space<smem>>
    %686 = vector.broadcast %685 : f32 to vector<2x128xf32>
    %687 = arith.mulf %684, %686 : vector<2x128xf32>
    %688 = arith.addf %674, %687 : vector<2x128xf32>
    %c1_458 = arith.constant 1 : index
    %c18_459 = arith.constant 18 : index
    %689 = memref.load %arg22[%c1_458, %c18_459] : memref<3x22xf32, #tpu.memory_space<smem>>
    %690 = vector.broadcast %689 : f32 to vector<2x128xf32>
    %691 = arith.mulf %684, %690 : vector<2x128xf32>
    %692 = arith.addf %678, %691 : vector<2x128xf32>
    %c2_460 = arith.constant 2 : index
    %c18_461 = arith.constant 18 : index
    %693 = memref.load %arg22[%c2_460, %c18_461] : memref<3x22xf32, #tpu.memory_space<smem>>
    %694 = vector.broadcast %693 : f32 to vector<2x128xf32>
    %695 = arith.mulf %684, %694 : vector<2x128xf32>
    %696 = arith.addf %682, %695 : vector<2x128xf32>
    %c0_462 = arith.constant 0 : index
    %c7_463 = arith.constant 7 : index
    %c0_464 = arith.constant 0 : index
    %c0_465 = arith.constant 0 : index
    %697 = vector.load %arg6[%c0_462, %c7_463, %c0_464, %c0_465] : memref<1x8x2x128xf32, #tpu.memory_space<vmem>>, vector<1x1x2x128xf32>
    %698 = vector.shape_cast %697 : vector<1x1x2x128xf32> to vector<2x128xf32>
    %c0_466 = arith.constant 0 : index
    %c19 = arith.constant 19 : index
    %699 = memref.load %arg22[%c0_466, %c19] : memref<3x22xf32, #tpu.memory_space<smem>>
    %700 = vector.broadcast %699 : f32 to vector<2x128xf32>
    %701 = arith.mulf %698, %700 : vector<2x128xf32>
    %702 = arith.addf %688, %701 : vector<2x128xf32>
    %c1_467 = arith.constant 1 : index
    %c19_468 = arith.constant 19 : index
    %703 = memref.load %arg22[%c1_467, %c19_468] : memref<3x22xf32, #tpu.memory_space<smem>>
    %704 = vector.broadcast %703 : f32 to vector<2x128xf32>
    %705 = arith.mulf %698, %704 : vector<2x128xf32>
    %706 = arith.addf %692, %705 : vector<2x128xf32>
    %c2_469 = arith.constant 2 : index
    %c19_470 = arith.constant 19 : index
    %707 = memref.load %arg22[%c2_469, %c19_470] : memref<3x22xf32, #tpu.memory_space<smem>>
    %708 = vector.broadcast %707 : f32 to vector<2x128xf32>
    %709 = arith.mulf %698, %708 : vector<2x128xf32>
    %710 = arith.addf %696, %709 : vector<2x128xf32>
    %c0_471 = arith.constant 0 : index
    %c0_472 = arith.constant 0 : index
    %c0_473 = arith.constant 0 : index
    %c0_474 = arith.constant 0 : index
    %711 = vector.load %arg3[%c0_471, %c0_472, %c0_473, %c0_474] : memref<1x1x2x128xf32, #tpu.memory_space<vmem>>, vector<1x1x2x128xf32>
    %712 = vector.shape_cast %711 : vector<1x1x2x128xf32> to vector<2x128xf32>
    %c0_475 = arith.constant 0 : index
    %c20 = arith.constant 20 : index
    %713 = memref.load %arg22[%c0_475, %c20] : memref<3x22xf32, #tpu.memory_space<smem>>
    %714 = vector.broadcast %713 : f32 to vector<2x128xf32>
    %715 = arith.mulf %712, %714 : vector<2x128xf32>
    %716 = arith.addf %702, %715 : vector<2x128xf32>
    %c1_476 = arith.constant 1 : index
    %c20_477 = arith.constant 20 : index
    %717 = memref.load %arg22[%c1_476, %c20_477] : memref<3x22xf32, #tpu.memory_space<smem>>
    %718 = vector.broadcast %717 : f32 to vector<2x128xf32>
    %719 = arith.mulf %712, %718 : vector<2x128xf32>
    %720 = arith.addf %706, %719 : vector<2x128xf32>
    %c2_478 = arith.constant 2 : index
    %c20_479 = arith.constant 20 : index
    %721 = memref.load %arg22[%c2_478, %c20_479] : memref<3x22xf32, #tpu.memory_space<smem>>
    %722 = vector.broadcast %721 : f32 to vector<2x128xf32>
    %723 = arith.mulf %712, %722 : vector<2x128xf32>
    %724 = arith.addf %710, %723 : vector<2x128xf32>
    %c0_480 = arith.constant 0 : index
    %c21 = arith.constant 21 : index
    %725 = memref.load %arg22[%c0_480, %c21] : memref<3x22xf32, #tpu.memory_space<smem>>
    %726 = vector.broadcast %725 : f32 to vector<2x128xf32>
    %727 = arith.mulf %425, %726 : vector<2x128xf32>
    %728 = arith.addf %716, %727 : vector<2x128xf32>
    %c1_481 = arith.constant 1 : index
    %c21_482 = arith.constant 21 : index
    %729 = memref.load %arg22[%c1_481, %c21_482] : memref<3x22xf32, #tpu.memory_space<smem>>
    %730 = vector.broadcast %729 : f32 to vector<2x128xf32>
    %731 = arith.mulf %425, %730 : vector<2x128xf32>
    %732 = arith.addf %720, %731 : vector<2x128xf32>
    %c2_483 = arith.constant 2 : index
    %c21_484 = arith.constant 21 : index
    %733 = memref.load %arg22[%c2_483, %c21_484] : memref<3x22xf32, #tpu.memory_space<smem>>
    %734 = vector.broadcast %733 : f32 to vector<2x128xf32>
    %735 = arith.mulf %425, %734 : vector<2x128xf32>
    %736 = arith.addf %724, %735 : vector<2x128xf32>
    %c0_485 = arith.constant 0 : index
    %737 = memref.load %arg23[%c0_485] : memref<3xf32, #tpu.memory_space<smem>>
    %738 = vector.broadcast %737 : f32 to vector<2x128xf32>
    %739 = arith.addf %728, %738 : vector<2x128xf32>
    %740 = math.tanh %739 : vector<2x128xf32>
    %c1_486 = arith.constant 1 : index
    %741 = memref.load %arg23[%c1_486] : memref<3xf32, #tpu.memory_space<smem>>
    %742 = vector.broadcast %741 : f32 to vector<2x128xf32>
    %743 = arith.addf %732, %742 : vector<2x128xf32>
    %744 = math.tanh %743 : vector<2x128xf32>
    %c2_487 = arith.constant 2 : index
    %745 = memref.load %arg23[%c2_487] : memref<3xf32, #tpu.memory_space<smem>>
    %746 = vector.broadcast %745 : f32 to vector<2x128xf32>
    %747 = arith.addf %736, %746 : vector<2x128xf32>
    %748 = math.tanh %747 : vector<2x128xf32>
    %c0_488 = arith.constant 0 : index
    %c9_489 = arith.constant 9 : index
    %c0_490 = arith.constant 0 : index
    %c0_491 = arith.constant 0 : index
    %749 = vector.load %arg24[%c0_488, %c9_489, %c0_490, %c0_491] : memref<1x12x2x128xf32, #tpu.memory_space<vmem>>, vector<1x1x2x128xf32>
    %750 = vector.shape_cast %749 : vector<1x1x2x128xf32> to vector<2x128xf32>
    %751 = vector.shape_cast %740 : vector<2x128xf32> to vector<1x1x2x128xf32>
    tpu.vector_store %arg24[%c0_488, %c9_489, %c0_490, %c0_491], %751 {strides = array<i32>} : memref<1x12x2x128xf32, #tpu.memory_space<vmem>>, vector<1x1x2x128xf32>,
    %c0_492 = arith.constant 0 : index
    %c10_493 = arith.constant 10 : index
    %c0_494 = arith.constant 0 : index
    %c0_495 = arith.constant 0 : index
    %752 = vector.load %arg24[%c0_492, %c10_493, %c0_494, %c0_495] : memref<1x12x2x128xf32, #tpu.memory_space<vmem>>, vector<1x1x2x128xf32>
    %753 = vector.shape_cast %752 : vector<1x1x2x128xf32> to vector<2x128xf32>
    %754 = vector.shape_cast %744 : vector<2x128xf32> to vector<1x1x2x128xf32>
    tpu.vector_store %arg24[%c0_492, %c10_493, %c0_494, %c0_495], %754 {strides = array<i32>} : memref<1x12x2x128xf32, #tpu.memory_space<vmem>>, vector<1x1x2x128xf32>,
    %c0_496 = arith.constant 0 : index
    %c11_497 = arith.constant 11 : index
    %c0_498 = arith.constant 0 : index
    %c0_499 = arith.constant 0 : index
    %755 = vector.load %arg24[%c0_496, %c11_497, %c0_498, %c0_499] : memref<1x12x2x128xf32, #tpu.memory_space<vmem>>, vector<1x1x2x128xf32>
    %756 = vector.shape_cast %755 : vector<1x1x2x128xf32> to vector<2x128xf32>
    %757 = vector.shape_cast %748 : vector<2x128xf32> to vector<1x1x2x128xf32>
    tpu.vector_store %arg24[%c0_496, %c11_497, %c0_498, %c0_499], %757 {strides = array<i32>} : memref<1x12x2x128xf32, #tpu.memory_space<vmem>>, vector<1x1x2x128xf32>,
    return
  }
  func.func @transform_0(%arg0: i32, %arg1: i32) -> (i32, i32, i32, i32) {
    %c0_i32 = arith.constant 0 : i32
    %c0_i32_0 = arith.constant 0 : i32
    %c0_i32_1 = arith.constant 0 : i32
    return %arg0, %c0_i32, %arg1, %c0_i32_0 : i32, i32, i32, i32
  }
  func.func @transform_1(%arg0: i32, %arg1: i32) -> (i32, i32, i32, i32) {
    %c0_i32 = arith.constant 0 : i32
    %c0_i32_0 = arith.constant 0 : i32
    %c0_i32_1 = arith.constant 0 : i32
    return %arg0, %c0_i32, %arg1, %c0_i32_0 : i32, i32, i32, i32
  }
  func.func @transform_2(%arg0: i32, %arg1: i32) -> (i32, i32, i32, i32) {
    %c0_i32 = arith.constant 0 : i32
    %c0_i32_0 = arith.constant 0 : i32
    %c0_i32_1 = arith.constant 0 : i32
    return %arg0, %c0_i32, %arg1, %c0_i32_0 : i32, i32, i32, i32
  }
  func.func @transform_3(%arg0: i32, %arg1: i32) -> (i32, i32, i32, i32) {
    %c0_i32 = arith.constant 0 : i32
    %c0_i32_0 = arith.constant 0 : i32
    %c0_i32_1 = arith.constant 0 : i32
    return %arg0, %c0_i32, %arg1, %c0_i32_0 : i32, i32, i32, i32
  }
  func.func @transform_4(%arg0: i32, %arg1: i32) -> (i32, i32, i32, i32) {
    %c0_i32 = arith.constant 0 : i32
    %c0_i32_0 = arith.constant 0 : i32
    %c0_i32_1 = arith.constant 0 : i32
    return %arg0, %c0_i32, %arg1, %c0_i32_0 : i32, i32, i32, i32
  }
  func.func @transform_5(%arg0: i32, %arg1: i32) -> (i32, i32, i32, i32) {
    %c0_i32 = arith.constant 0 : i32
    %c0_i32_0 = arith.constant 0 : i32
    %c0_i32_1 = arith.constant 0 : i32
    return %arg0, %c0_i32, %arg1, %c0_i32_0 : i32, i32, i32, i32
  }
  func.func @transform_6(%arg0: i32, %arg1: i32) -> (i32, i32, i32, i32) {
    %c0_i32 = arith.constant 0 : i32
    %c0_i32_0 = arith.constant 0 : i32
    %c0_i32_1 = arith.constant 0 : i32
    return %arg0, %c0_i32, %arg1, %c0_i32_0 : i32, i32, i32, i32
  }
  func.func @transform_7(%arg0: i32, %arg1: i32) -> (i32, i32, i32, i32) {
    %c0_i32 = arith.constant 0 : i32
    %c0_i32_0 = arith.constant 0 : i32
    %c0_i32_1 = arith.constant 0 : i32
    return %arg0, %c0_i32, %arg1, %c0_i32_0 : i32, i32, i32, i32
  }
  func.func @transform_8(%arg0: i32, %arg1: i32) -> (i32, i32, i32, i32) {
    %c0_i32 = arith.constant 0 : i32
    %c0_i32_0 = arith.constant 0 : i32
    %c0_i32_1 = arith.constant 0 : i32
    return %arg0, %c0_i32, %arg1, %c0_i32_0 : i32, i32, i32, i32
  }
  func.func @transform_9(%arg0: i32, %arg1: i32) -> (i32, i32, i32, i32) {
    %c0_i32 = arith.constant 0 : i32
    %c0_i32_0 = arith.constant 0 : i32
    %c0_i32_1 = arith.constant 0 : i32
    return %arg0, %c0_i32, %arg1, %c0_i32_0 : i32, i32, i32, i32
  }
  func.func @transform_10(%arg0: i32, %arg1: i32) -> (i32, i32, i32, i32) {
    %c0_i32 = arith.constant 0 : i32
    %c0_i32_0 = arith.constant 0 : i32
    %c0_i32_1 = arith.constant 0 : i32
    return %arg0, %c0_i32, %arg1, %c0_i32_0 : i32, i32, i32, i32
  }
  func.func @transform_11(%arg0: i32, %arg1: i32) -> (i32, i32, i32, i32) {
    %c0_i32 = arith.constant 0 : i32
    %c0_i32_0 = arith.constant 0 : i32
    %c0_i32_1 = arith.constant 0 : i32
    return %arg0, %c0_i32, %arg1, %c0_i32_0 : i32, i32, i32, i32
  }
  func.func @transform_12(%arg0: i32, %arg1: i32) -> (i32, i32, i32, i32) {
    %c0_i32 = arith.constant 0 : i32
    %c0_i32_0 = arith.constant 0 : i32
    %c0_i32_1 = arith.constant 0 : i32
    return %arg0, %c0_i32, %arg1, %c0_i32_0 : i32, i32, i32, i32
  }
  func.func @transform_13(%arg0: i32, %arg1: i32) -> (i32, i32, i32, i32) {
    %c0_i32 = arith.constant 0 : i32
    %c0_i32_0 = arith.constant 0 : i32
    %c0_i32_1 = arith.constant 0 : i32
    return %arg0, %c0_i32, %arg1, %c0_i32_0 : i32, i32, i32, i32
  }
  func.func @transform_14(%arg0: i32, %arg1: i32) -> (i32, i32) {
    %c0_i32 = arith.constant 0 : i32
    %c0_i32_0 = arith.constant 0 : i32
    %c0_i32_1 = arith.constant 0 : i32
    return %c0_i32, %c0_i32_0 : i32, i32
  }
  func.func @transform_15(%arg0: i32, %arg1: i32) -> i32 {
    %c0_i32 = arith.constant 0 : i32
    %c0_i32_0 = arith.constant 0 : i32
    return %c0_i32 : i32
  }
  func.func @transform_16(%arg0: i32, %arg1: i32) -> (i32, i32) {
    %c0_i32 = arith.constant 0 : i32
    %c0_i32_0 = arith.constant 0 : i32
    %c0_i32_1 = arith.constant 0 : i32
    return %c0_i32, %c0_i32_0 : i32, i32
  }
  func.func @transform_17(%arg0: i32, %arg1: i32) -> i32 {
    %c0_i32 = arith.constant 0 : i32
    %c0_i32_0 = arith.constant 0 : i32
    return %c0_i32 : i32
  }
  func.func @transform_18(%arg0: i32, %arg1: i32) -> (i32, i32) {
    %c0_i32 = arith.constant 0 : i32
    %c0_i32_0 = arith.constant 0 : i32
    %c0_i32_1 = arith.constant 0 : i32
    return %c0_i32, %c0_i32_0 : i32, i32
  }
  func.func @transform_19(%arg0: i32, %arg1: i32) -> i32 {
    %c0_i32 = arith.constant 0 : i32
    %c0_i32_0 = arith.constant 0 : i32
    return %c0_i32 : i32
  }
  func.func @transform_20(%arg0: i32, %arg1: i32) -> (i32, i32) {
    %c0_i32 = arith.constant 0 : i32
    %c0_i32_0 = arith.constant 0 : i32
    %c0_i32_1 = arith.constant 0 : i32
    return %c0_i32, %c0_i32_0 : i32, i32
  }
  func.func @transform_21(%arg0: i32, %arg1: i32) -> i32 {
    %c0_i32 = arith.constant 0 : i32
    %c0_i32_0 = arith.constant 0 : i32
    return %c0_i32 : i32
  }
  func.func @transform_22(%arg0: i32, %arg1: i32) -> (i32, i32, i32, i32) {
    %c0_i32 = arith.constant 0 : i32
    %c0_i32_0 = arith.constant 0 : i32
    %c0_i32_1 = arith.constant 0 : i32
    return %arg0, %c0_i32, %arg1, %c0_i32_0 : i32, i32, i32, i32
  }
}

</mosaic_0001>

<bundles_post_ra>
// kernel: _g_stage_forward.1
= control target key start
LH: loop header
LB: loop body
LE: loop exit
PB: predicated region body
PF: predicated region fallthrough
CT: control target
= control target key end

     0   :  { %s3744_s0 = inlined_call_operand.vmem [shape: f32[2,3,2,128], index: 0, kind: input, shape index: {}]   ;;  %s3745_s1 = inlined_call_operand.vmem [shape: f32[2,1,2,128], index: 1, kind: input, shape index: {}]   ;;  %s3746_s2 = inlined_call_operand.vmem [shape: f32[2,1,2,128], index: 2, kind: input, shape index: {}]   ;;  %s3747_s3 = inlined_call_operand.vmem [shape: f32[2,8,2,128], index: 3, kind: input, shape index: {}]   ;;  %s3748_s4 = inlined_call_operand.vmem [shape: f32[2,8,2,128], index: 4, kind: input, shape index: {}]   ;;  %s3749_s5 = inlined_call_operand.vmem [shape: f32[2,1,2,128], index: 5, kind: input, shape index: {}]   ;;  %s3750_s6 = inlined_call_operand.vmem [shape: f32[2,3,2,128], index: 6, kind: input, shape index: {}]   ;;  %s3751_s7 = inlined_call_operand.vmem [shape: f32[2,1,2,128], index: 7, kind: input, shape index: {}]   ;;  %s3752_s8 = inlined_call_operand.vmem [shape: f32[2,1,2,128], index: 8, kind: input, shape index: {}]   ;;  %s3753_s9 = inlined_call_operand.vmem [shape: f32[2,3,2,128], index: 9, kind: input, shape index: {}]   ;;  %s3754_s10 = inlined_call_operand.vmem [shape: f32[2,3,2,128], index: 10, kind: input, shape index: {}]   ;;  %s3755_s11 = inlined_call_operand.vmem [shape: f32[2,1,2,128], index: 11, kind: input, shape index: {}]   ;;  %s3756_s12 = inlined_call_operand.vmem [shape: f32[2,1,2,128], index: 12, kind: input, shape index: {}]   ;;  %s3757_s13 = inlined_call_operand.vmem [shape: f32[2,3,2,128], index: 13, kind: input, shape index: {}]   ;;  %s3758_s14 = inlined_call_operand.vmem [shape: f32[3,5], index: 14, kind: input, shape index: {}]   ;;  %s3759_s15 = inlined_call_operand.vmem [shape: f32[3], index: 15, kind: input, shape index: {}]   ;;  %s3760_s16 = inlined_call_operand.vmem [shape: f32[3,6], index: 16, kind: input, shape index: {}]   ;;  %s3761_s17 = inlined_call_operand.vmem [shape: f32[3], index: 17, kind: input, shape index: {}]   ;;  %s3762_s18 = inlined_call_operand.vmem [shape: f32[3,4], index: 18, kind: input, shape index: {}]   ;;  %s3763_s19 = inlined_call_operand.vmem [shape: f32[3], index: 19, kind: input, shape index: {}]   ;;  %s3764_s20 = inlined_call_operand.vmem [shape: f32[3,22], index: 20, kind: input, shape index: {}]   ;;  %s3765_s21 = inlined_call_operand.vmem [shape: f32[3], index: 21, kind: input, shape index: {}]   ;;  %s3766_s22 = inlined_call_operand.vmem [shape: f32[2,12,2,128], index: 22, kind: output, shape index: {}]  }
   0x1   :  { %3768 = sst [smem:[#allocation21_spill]] %s3744_s0 }
   0x2   :  { %3769 = sst [smem:[#allocation22_spill]] %s3745_s1 }
   0x3   :  { %3770 = sst [smem:[#allocation23_spill]] %s3746_s2 }
   0x4   :  { %3771 = sst [smem:[#allocation24_spill]] %s3747_s3 }
   0x5   :  { %3772 = sst [smem:[#allocation25_spill]] %s3748_s4 }
   0x6   :  { %3773 = sst [smem:[#allocation26_spill]] %s3749_s5 }
   0x7   :  { %3774 = sst [smem:[#allocation27_spill]] %s3750_s6 }
   0x8   :  { %3775 = sst [smem:[#allocation28_spill]] %s3751_s7 }
   0x9   :  { %3776 = sst [smem:[#allocation29_spill]] %s3752_s8 }
   0xa   :  { %3777 = sst [smem:[#allocation30_spill]] %s3753_s9 }
   0xb   :  { %3778 = sst [smem:[#allocation31_spill]] %s3754_s10 }
   0xc   :  { %3779 = sst [smem:[#allocation32_spill]] %s3755_s11 }
   0xd   :  { %3780 = sst [smem:[#allocation33_spill]] %s3756_s12 }
   0xe   :  { %3781 = sst [smem:[#allocation34_spill]] %s3757_s13 }
   0xf   :  { %3782 = sst [smem:[#allocation35_spill]] %s3758_s14 }
  0x10   :  { %3783 = sst [smem:[#allocation36_spill]] %s3759_s15 }
  0x11   :  { %3784 = sst [smem:[#allocation37_spill]] %s3760_s16 }
  0x12   :  { %3785 = sst [smem:[#allocation38_spill]] %s3761_s17 }
  0x13   :  { %3786 = sst [smem:[#allocation39_spill]] %s3763_s19 }
  0x14   :  { %27 = vsyncpa [#allocation3], 0 }
  0x15   :  { %28 = vsyncpa [#allocation5], 0 }
  0x16   :  { %29 = vsyncpa [#allocation8], 0 }
  0x17   :  { %30 = vsyncpa [#allocation11], 0 }
  0x18   :  { %31 = vsyncpa [#allocation14], 0  ;;  %s2960_s3 = smov 0   ;;  %s2962_s28 = smov 0  }
  0x19   :  { %s2964_s29 = smov 0  }
  0x1a LB: > { %3787 = sst [smem:[#allocation20_spill]] %s2835_s29  ;;  %s2301_s23 = sadd.s32 4294967295, %s2835_s29   ;;  %s2835_s29 = sphi %s2964_s29, %s37_s29   ;;  %s2831_s28 = sphi %s2962_s28, %s3815_s28   ;;  %s2827_s3 = sphi %s2960_s3, %s3814_s3  }
  0x1b   : > { %s3788_s15 = sld [smem:[#allocation36_spill]]  ;;  %p2303_p0 = scmp.ge.s32.totalorder %s2835_s29, 1 }
  0x1c   : > { %p642_p1 = scmp.lt.s32.totalorder %s2835_s29, 3  ;;  %p2981_p2 = scmp.eq.s32.totalorder %s2301_s23, 0 }
  0x1d   : > { %s3791_s17 = sld [smem:[#allocation38_spill]]  ;;  %s2837_s4 = smov [#allocation4]  }
  0x1e   : > { %p2985_p3 = pnand %p2303_p0, %p642_p1  ;;  %s3792_s19 = sld [smem:[#allocation39_spill]] }
  0x1f   : > { %s2838_s23 = smov [#allocation7]   ;;  %s2839_s24 = smov [#allocation10]  }
  0x20   : > { %p2564_p4 = pneg %p2985_p3  ;;  %s49_s6 = sadd.s32 1, %s2831_s28 }
  0x21   : > { %s664_s0 = sshll.u32 %s3788_s15, 4  ;;  %s3794_s14 = sld [smem:[#allocation35_spill]]  ;;  %s665_s0 = int_to_ptr.vmem [resolvable:$true] %s664_s0 }
  0x22   : > { %p2999_p5 = pnand %p2981_p2, %p2564_p4  ;;  %p51_p6 = scmp.ge.s32.totalorder %s49_s6, 2 }
  0x23   : > { %s684_s25 = sshll.u32 %s3791_s17, 4  ;;  %s3795_s16 = sld [smem:[#allocation37_spill]]  ;;  %s685_s25 = int_to_ptr.vmem [resolvable:$true] %s684_s25 }
  0x24   : > { %s704_s27 = sshll.u32 %s3792_s19, 4  ;;  %s3817_s6 = smov (%p51_p6, %s49_s6), 0  ;;  %s705_s27 = int_to_ptr.vmem [resolvable:$true] %s704_s27 }
  0x25   : > { %2570 = dma.vmem_to_smem (!%p2999_p5), %s665_s0, 16, %s2837_s4, [#allocation5]  }
  0x26   : > { %2576 = dma.vmem_to_smem (!%p2999_p5), %s685_s25, 16, %s2838_s23, [#allocation8]  }
  0x27   : > { %2582 = dma.vmem_to_smem (!%p2999_p5), %s705_s27, 16, %s2839_s24, [#allocation11]  }
  0x28   : > { %s654_s15 = sshll.u32 %s3794_s14, 4  ;;  %s2840_s0 = smov [#allocation2]   ;;  %s655_s15 = int_to_ptr.vmem [resolvable:$true] %s654_s15 }
  0x29   : > { %s674_s29 = sshll.u32 %s3795_s16, 4  ;;  %s2841_s25 = smov [#allocation6]   ;;  %s675_s29 = int_to_ptr.vmem [resolvable:$true] %s674_s29 }
  0x2a   : > { %2567 = dma.vmem_to_smem (!%p2999_p5), %s655_s15, 64, %s2840_s0, [#allocation3]  }
  0x2b   : > { %2573 = dma.vmem_to_smem (!%p2999_p5), %s675_s29, 64, %s2841_s25, [#allocation5]  }
  0x2c   : > { %s694_s23 = sshll.u32 %s3762_s18, 4  ;;  %s714_s17 = sshll.u32 %s3764_s20, 4  ;;  %s695_s23 = int_to_ptr.vmem [resolvable:$true] %s694_s23  ;;  %s715_s17 = int_to_ptr.vmem [resolvable:$true] %s714_s17 }
  0x2d   : > { %s2842_s19 = smov [#allocation9]   ;;  %s2843_s2 = smov [#allocation12]  }
  0x2e   : > { %2579 = dma.vmem_to_smem (!%p2999_p5), %s695_s23, 64, %s2842_s19, [#allocation8]  }
  0x2f   : > { %2585 = dma.vmem_to_smem (!%p2999_p5), %s715_s17, 64, %s2843_s2, [#allocation11]  }
  0x30   : > { %s724_s29 = sshll.u32 %s3765_s21, 4  ;;  %s2844_s25 = smov [#allocation13]   ;;  %s725_s29 = int_to_ptr.vmem [resolvable:$true] %s724_s29 }
  0x31   : > { %2588 = dma.vmem_to_smem (!%p2999_p5), %s725_s29, 16, %s2844_s25, [#allocation14]  }
  0x32   : > { %884 = sbr.rel (%p2985_p3) target bundleno = 239 (0xef), region = 108 }
  0x37   : > { %2806 = dma.done.wait (%p2981_p2), [#allocation3], 64  }
  0x38   : > { %2808 = vsyncadd (%p2981_p2), [#allocation3], 4294967232 }
  0x39   : > { %2810 = dma.done.wait (%p2981_p2), [#allocation5], 80  }
  0x3a   : > { %2812 = vsyncadd (%p2981_p2), [#allocation5], 4294967216 }
  0x3b   : > { %2814 = dma.done.wait (%p2981_p2), [#allocation8], 80  }
  0x3c   : > { %2816 = vsyncadd (%p2981_p2), [#allocation8], 4294967216 }
  0x3d   : > { %2818 = dma.done.wait (%p2981_p2), [#allocation11], 80  }
  0x3e   : > { %2820 = vsyncadd (%p2981_p2), [#allocation11], 4294967216 }
  0x3f   : > { %2822 = dma.done.wait (%p2981_p2), [#allocation14], 16  }
  0x40   : > { %2824 = vsyncadd (%p2981_p2), [#allocation14], 4294967280 }
  0x41   : > { %926 = sfence }
  0x42   : > { %p1086_p7 = scmp.lt.s32.totalorder %s2827_s3, 1  ;;  %s1200_s5 = sld [smem:[#allocation2]] }
  0x43   : > { %s2339_s30 = sld [smem:[#allocation2 + $0x80]] }
  0x44   : > { %s3819_s3 = smov (!%p1086_p7, %s2827_s3), 1  ;;  %s3063_s27 = sld [smem:[#allocation2 + $0x100]] }
  0x45   : > { %s3066_s4 = smul.u32 6, %s3819_s3  ;;  %s3796_s26 = sld [smem:[#allocation27_spill]] }
  0x46   : > { %s3797_s10 = sld [smem:[#allocation31_spill]] }
  0x47   : > { %s2342_s15 = sld [smem:[#allocation2 + $0x1]] }
  0x48   : > { %s2343_s0 = sld [smem:[#allocation2 + $0x81]]  ;;  %v1201_v1 = vstv %s1200_s5 }
  0x49   : > { %s3078_s29 = sld [smem:[#allocation2 + $0x101]]  ;;  %v1204_v3 = vstv %s2339_s30 }
  0x4a   : > { %s3081_s25 = sld [smem:[#allocation2 + $0x2]]  ;;  %v1207_v4 = vstv %s3063_s27 }
  0x4b   : > { %s1138_s1 = scalar_lea.vmem %s3796_s26, %s3066_s4  ;;  %s3084_s23 = sld [smem:[#allocation2 + $0x82]] }
  0x4c   : > { %s3076_s2 = scalar_lea.vmem %s3797_s10, %s3066_s4  ;;  %v1199_v0 = vld [vmem:[%s1138_s1] sm:$0x3]  ;;  %v2341_v5 = vld [vmem:[%s1138_s1 + $0x2] sm:$0x3]  ;;  %s3087_s24 = sld [smem:[#allocation2 + $0x102]] }
  0x4d   : > { %v1366_v2 = vld [vmem:[%s3076_s2] sm:$0x3]  ;;  %v2382_v6 = vld [vmem:[%s3076_s2 + $0x2] sm:$0x3]  ;;  %v1202_v7 = vmul.f32 %v1201_v1, %v1199_v0  ;;  %s3090_s26 = sshll.u32 %s3819_s3, 1  ;;  %v1205_v9 = vmul.f32 %v1204_v3, %v1199_v0  ;;  %v1212_v10 = vstv %s2342_s15  ;;  %s3092_s5 = sld [smem:[#allocation2 + $0x3]]  ;;  %v1208_v12 = vmul.f32 %v1207_v4, %v1199_v0 }
  0x4e   : > { %v1369_v8 = vmul.f32 %v1366_v2, %v1201_v1  ;;  %v1372_v11 = vmul.f32 %v1366_v2, %v1204_v3  ;;  %s3798_s7 = sld [smem:[#allocation28_spill]]  ;;  %v1213_v13 = vmul.f32 %v2341_v5, %v1212_v10  ;;  %v1216_v14 = vstv %s2343_s0  ;;  %v2345_v15 = vld [vmem:[%s1138_s1 + $0x4] sm:$0x3] }
  0x4f   : > { %s3098_s19 = sld [smem:[#allocation2 + $0x83]]  ;;  %v1380_v16 = vmul.f32 %v2382_v6, %v1212_v10  ;;  %v1217_v17 = vmul.f32 %v2341_v5, %v1216_v14  ;;  %v1220_v18 = vstv %s3078_s29  ;;  %v1384_v19 = vmul.f32 %v2382_v6, %v1216_v14  ;;  %v2386_v24 = vld [vmem:[%s3076_s2 + $0x4] sm:$0x3] }
  0x50   : > { %s3101_s15 = sld [smem:[#allocation2 + $0x103]]  ;;  %v1375_v20 = vmul.f32 %v1366_v2, %v1207_v4  ;;  %v1214_v21 = vadd.f32 %v1213_v13, %v1202_v7  ;;  %v1221_v22 = vmul.f32 %v2341_v5, %v1220_v18  ;;  %v1226_v23 = vstv %s3081_s25 }
  0x51   : > { %s3104_s30 = sld [smem:[#allocation2 + $0x4]]  ;;  %v1381_v25 = vadd.f32 %v1380_v16, %v1369_v8  ;;  %v1218_v26 = vadd.f32 %v1217_v17, %v1205_v9  ;;  %v1227_v27 = vmul.f32 %v2345_v15, %v1226_v23  ;;  %v1230_v28 = vstv %s3084_s23 }
  0x52   : > { %s3799_s8 = sld [smem:[#allocation29_spill]]  ;;  %v1385_v30 = vadd.f32 %v1384_v19, %v1372_v11  ;;  %v1222_v31 = vadd.f32 %v1221_v22, %v1208_v12  ;;  %v1231_v32 = vmul.f32 %v2345_v15, %v1230_v28  ;;  %v1234_v33 = vstv %s3087_s24 }
  0x53   : > { %s3112_s29 = sld [smem:[#allocation2 + $0x84]]  ;;  %v1388_v34 = vmul.f32 %v2382_v6, %v1220_v18  ;;  %v1228_v35 = vadd.f32 %v1227_v27, %v1214_v21  ;;  %v1235_v36 = vmul.f32 %v2345_v15, %v1234_v33  ;;  %v1239_v37 = vstv %s3092_s5 }
  0x54   : > { %s1145_s17 = scalar_lea.vmem %s3798_s7, %s3090_s26  ;;  %s3115_s25 = sld [smem:[#allocation2 + $0x104]]  ;;  %v1394_v38 = vmul.f32 %v2386_v24, %v1226_v23  ;;  %v1232_v39 = vadd.f32 %v1231_v32, %v1218_v26  ;;  %v1398_v51 = vmul.f32 %v2386_v24, %v1230_v28  ;;  %v1402_v55 = vmul.f32 %v2386_v24, %v1234_v33 }
  0x55   : > { %v1237_v29 = vld [vmem:[%s1145_s17] sm:$0x3]  ;;  %s3118_s2 = sld [smem:[#allocation4]]  ;;  %v1243_v41 = vstv %s3098_s19  ;;  %v1389_v43 = vadd.f32 %v1388_v34, %v1375_v20  ;;  %v1236_v44 = vadd.f32 %v1235_v36, %v1222_v31 }
  0x56   : > { %v1240_v40 = vmul.f32 %v1239_v37, %v1237_v29  ;;  %s3121_s23 = sld [smem:[#allocation4 + $0x1]]  ;;  %v1244_v45 = vmul.f32 %v1243_v41, %v1237_v29  ;;  %v1247_v46 = vstv %s3101_s15  ;;  %v1395_v47 = vadd.f32 %v1394_v38, %v1381_v25 }
  0x57   : > { %s3800_s11 = sld [smem:[#allocation32_spill]]  ;;  %v1248_v49 = vmul.f32 %v1247_v46, %v1237_v29  ;;  %v1252_v50 = vstv %s3104_s30  ;;  %v1399_v60 = vadd.f32 %v1398_v51, %v1385_v30  ;;  %v1403_v0 = vadd.f32 %v1402_v55, %v1389_v43 }
  0x58   : > { %s1152_s27 = scalar_lea.vmem %s3799_s8, %s3090_s26  ;;  %s3128_s5 = sld [smem:[#allocation4 + $0x2]]  ;;  %v1241_v48 = vadd.f32 %v1240_v40, %v1228_v35  ;;  %v1245_v52 = vadd.f32 %v1244_v45, %v1232_v39 }
  0x59   : > { %v1250_v42 = vld [vmem:[%s1152_s27] sm:$0x3]  ;;  %s3131_s19 = sld [smem:[#allocation6]]  ;;  %v1256_v54 = vstv %s3112_s29  ;;  %v1249_v57 = vadd.f32 %v1248_v49, %v1236_v44 }
  0x5a   : > { %v1253_v53 = vmul.f32 %v1252_v50, %v1250_v42  ;;  %s3134_s0 = sld [smem:[#allocation6 + $0x1]]  ;;  %v1257_v58 = vmul.f32 %v1256_v54, %v1250_v42  ;;  %v1260_v59 = vstv %s3115_s25 }
  0x5b   : > { %s3137_s15 = sld [smem:[#allocation6 + $0x2]]  ;;  %v1261_v62 = vmul.f32 %v1260_v59, %v1250_v42  ;;  %v1264_v63 = vstv %s3118_s2 }
  0x5c   : > { %s3801_s12 = sld [smem:[#allocation33_spill]]  ;;  %v1254_v61 = vadd.f32 %v1253_v53, %v1241_v48  ;;  %v1258_v1 = vadd.f32 %v1257_v58, %v1245_v52  ;;  %v1268_v2 = vstv %s3121_s23 }
  0x5d   : > { %s1175_s1 = scalar_lea.vmem %s3800_s11, %s3090_s26  ;;  %s3144_s29 = sld [smem:[#allocation6 + $0x3]]  ;;  %v1262_v5 = vadd.f32 %v1261_v62, %v1249_v57 }
  0x5e   : > { %v1404_v56 = vld [vmem:[%s1175_s1] sm:$0x3]  ;;  %s3147_s24 = sld [smem:[#allocation6 + $0x4]]  ;;  %v1265_v6 = vadd.f32 %v1264_v63, %v1254_v61  ;;  %v1272_v7 = vstv %s3128_s5  ;;  %v1269_v10 = vadd.f32 %v1268_v2, %v1258_v1 }
  0x5f   : > { %v1407_v3 = vmul.f32 %v1404_v56, %v1239_v37  ;;  %v1411_v4 = vmul.f32 %v1404_v56, %v1243_v41  ;;  %s3802_s9 = sld [smem:[#allocation30_spill]]  ;;  %v1415_v8 = vmul.f32 %v1404_v56, %v1247_v46  ;;  %v1273_v13 = vadd.f32 %v1272_v7, %v1262_v5 }
  0x60   : > { %s3156_s2 = sld [smem:[#allocation6 + $0x5]]  ;;  %2637 = vtanh.f32 %v1265_v6  ;;  %v1276_v18 = vstv %s3131_s19  ;;  %v1285_v23 = vstv %s3134_s0 }
  0x61   : > { %s3158_s23 = sld [smem:[#allocation7]]  ;;  %v1408_v11 = vadd.f32 %v1407_v3, %v1395_v47  ;;  %v1412_v12 = vadd.f32 %v1411_v4, %v1399_v60  ;;  %v1416_v14 = vadd.f32 %v1415_v8, %v1403_v0  ;;  %2639 = vtanh.f32 %v1269_v10 }
  0x62   : > { %s1182_s17 = scalar_lea.vmem %s3801_s12, %s3090_s26  ;;  %s3803_s13 = sld [smem:[#allocation34_spill]]  ;;  %2641 = vtanh.f32 %v1273_v13  ;;  %v1297_v28 = vstv %s3137_s15 }
  0x63   : > { %v1417_v9 = vld [vmem:[%s1182_s17] sm:$0x3]  ;;  %s3166_s5 = sld [smem:[#allocation6 + $0x80]]  ;;  %v1310_v19 = vstv %s3144_s29  ;;  %s3808_s12 = sshll.u32 %s3819_s3, 4 }
  0x64   : > { %s3171_s17 = sld [smem:[#allocation6 + $0x81]]  ;;  %v1420_v16 = vmul.f32 %v1417_v9, %v1252_v50  ;;  %v1424_v17 = vmul.f32 %v1417_v9, %v1256_v54  ;;  %v1428_v21 = vmul.f32 %v1417_v9, %v1260_v59  ;;  %v1324_v24 = vstv %s3147_s24 }
  0x65   : > { %s3153_s27 = scalar_lea.vmem %s3802_s9, %s3066_s4  ;;  %s3178_s7 = sld [smem:[#allocation6 + $0x82]] }
  0x66   : > { %v3169_v15 = vld [vmem:[%s3153_s27] sm:$0x3]  ;;  %v3176_v20 = vld [vmem:[%s3153_s27 + $0x2] sm:$0x3]  ;;  %v3186_v25 = vld [vmem:[%s3153_s27 + $0x4] sm:$0x3]  ;;  %v1421_v26 = vadd.f32 %v1420_v16, %v1408_v11  ;;  %v1425_v27 = vadd.f32 %v1424_v17, %v1412_v12  ;;  %v1338_v30 = vstv %s3156_s2  ;;  %v1429_v31 = vadd.f32 %v1428_v21, %v1416_v14  ;;  %v2638_v36 = vpop.eup %2637 }
  0x67   : > { %s3188_s1 = sld [smem:[#allocation6 + $0x83]]  ;;  %v1311_v29 = vmul.f32 %v1310_v19, %v3169_v15  ;;  %v1325_v32 = vmul.f32 %v3176_v20, %v1324_v24  ;;  %v3202_v37 = vmul.f32 %v3186_v25, %v1338_v30  ;;  %v1350_v38 = vstv %s3158_s23  ;;  %v2640_v41 = vpop.eup %2639 }
  0x68   : > { %s3164_s25 = scalar_lea.vmem %s3803_s13, %s3066_s4  ;;  %s3193_s29 = sld [smem:[#allocation6 + $0x84]]  ;;  %v1432_v33 = vadd.f32 %v1421_v26, %v1264_v63  ;;  %v1436_v34 = vadd.f32 %v1425_v27, %v1268_v2  ;;  %v1440_v40 = vadd.f32 %v1429_v31, %v1272_v7  ;;  %v1277_v42 = vmul.f32 %v2638_v36, %v1276_v18  ;;  %v2642_v45 = vpop.eup %2641 }
  0x69   : > { %v3181_v22 = vld [vmem:[%s3164_s25] sm:$0x3]  ;;  %s3196_s24 = sld [smem:[#allocation6 + $0x85]]  ;;  %v1279_v39 = vstv %s3166_s5  ;;  %v1286_v46 = vmul.f32 %v2640_v41, %v1285_v23  ;;  %v3223_v49 = vld [vmem:[%s3164_s25 + $0x2] sm:$0x3]  ;;  %v1298_v51 = vmul.f32 %v2642_v45, %v1297_v28 }
  0x6a   : > { %v3199_v35 = vmul.f32 %v3181_v22, %v1310_v19  ;;  %s3206_s27 = sld [smem:[#allocation7 + $0x1]]  ;;  %v1280_v43 = vmul.f32 %v2638_v36, %v1279_v39  ;;  %v1289_v44 = vstv %s3171_s17  ;;  %2643 = vtanh.f32 %v1432_v33  ;;  %v3226_v50 = vld [vmem:[%s3164_s25 + $0x4] sm:$0x3] }
  0x6b   : > { %s3213_s2 = sld [smem:[#allocation6 + $0x100]]  ;;  %v1290_v47 = vmul.f32 %v2640_v41, %v1289_v44  ;;  %v1301_v48 = vstv %s3178_s7  ;;  %2645 = vtanh.f32 %v1436_v34  ;;  %v1287_v54 = vadd.f32 %v1286_v46, %v1277_v42 }
  0x6c   : > { %s3220_s30 = sld [smem:[#allocation6 + $0x101]]  ;;  %v1302_v52 = vmul.f32 %v2642_v45, %v1301_v48  ;;  %2647 = vtanh.f32 %v1440_v40  ;;  %v3244_v60 = vmul.f32 %v3223_v49, %v1324_v24  ;;  %v3247_v61 = vmul.f32 %v3226_v50, %v1338_v30 }
  0x6d   : > { %v1314_v53 = vstv %s3188_s1  ;;  %s3233_s8 = sld [smem:[#allocation6 + $0x102]]  ;;  %v1291_v55 = vadd.f32 %v1290_v47, %v1280_v43  ;;  %v1299_v62 = vadd.f32 %v1298_v51, %v1287_v54 }
  0x6e   : > { %v1315_v56 = vmul.f32 %v1314_v53, %v3169_v15  ;;  %v1328_v57 = vstv %s3193_s29  ;;  %s3237_s9 = sld [smem:[#allocation6 + $0x103]]  ;;  %v3252_v0 = vmul.f32 %v3181_v22, %v1314_v53 }
  0x6f   : > { %v1329_v58 = vmul.f32 %v3176_v20, %v1328_v57  ;;  %v1342_v59 = vstv %s3196_s24  ;;  %s3241_s25 = sld [smem:[#allocation6 + $0x104]]  ;;  %v1303_v63 = vadd.f32 %v1302_v52, %v1291_v55  ;;  %v3255_v1 = vmul.f32 %v3223_v49, %v1328_v57 }
  0x70   : > { %s3249_s1 = sld [smem:[#allocation6 + $0x105]]  ;;  %v2644_v2 = vpop.eup %2643  ;;  %v1343_v3 = vmul.f32 %v3186_v25, %v1342_v59  ;;  %v1354_v4 = vstv %s3206_s27  ;;  %v3263_v6 = vmul.f32 %v3226_v50, %v1342_v59  ;;  %v1312_v8 = vadd.f32 %v1311_v29, %v1299_v62 }
  0x71   : > { %v1282_v5 = vstv %s3213_s2  ;;  %s3260_s29 = sld [smem:[#allocation7 + $0x2]]  ;;  %v2646_v7 = vpop.eup %2645  ;;  %v1316_v9 = vadd.f32 %v1315_v56, %v1303_v63  ;;  %v1444_v16 = vmul.f32 %v2644_v2, %v1276_v18  ;;  %v1447_v42 = vmul.f32 %v2644_v2, %v1279_v39 }
  0x72   : > { %v1283_v10 = vmul.f32 %v2638_v36, %v1282_v5  ;;  %v1293_v11 = vstv %s3220_s30  ;;  %v2648_v12 = vpop.eup %2647  ;;  %v1453_v17 = vmul.f32 %v2646_v7, %v1285_v23  ;;  %v1326_v19 = vadd.f32 %v1325_v32, %v1312_v8  ;;  %s3272_s24 = sld [smem:[#allocation9]] }
  0x73   : > { %v1294_v13 = vmul.f32 %v2640_v41, %v1293_v11  ;;  %v1305_v14 = vstv %s3233_s8  ;;  %v1330_v21 = vadd.f32 %v1329_v58, %v1316_v9  ;;  %s3276_s8 = sld [smem:[#allocation9 + $0x1]]  ;;  %v1465_v40 = vmul.f32 %v2648_v12, %v1297_v28 }
  0x74   : > { %v1306_v24 = vmul.f32 %v2642_v45, %v1305_v14  ;;  %v1318_v26 = vstv %s3237_s9  ;;  %v1454_v31 = vadd.f32 %v1453_v17, %v1444_v16  ;;  %v1340_v18 = vadd.f32 %v3202_v37, %v1326_v19  ;;  %s3281_s9 = sld [smem:[#allocation9 + $0x2]] }
  0x75   : > { %v1295_v27 = vadd.f32 %v1294_v13, %v1283_v10  ;;  %v1319_v29 = vmul.f32 %v1318_v26, %v3169_v15  ;;  %v1332_v30 = vstv %s3241_s25  ;;  %v1344_v23 = vadd.f32 %v1343_v3, %v1330_v21  ;;  %s3287_s19 = sld [smem:[#allocation9 + $0x3]] }
  0x76   : > { %v1333_v32 = vmul.f32 %v3176_v20, %v1332_v30  ;;  %v1346_v33 = vstv %s3249_s1  ;;  %v1351_v41 = vadd.f32 %v1350_v38, %v1340_v18  ;;  %v1457_v20 = vmul.f32 %v2646_v7, %v1289_v44  ;;  %s3300_s15 = sld [smem:[#allocation10]] }
  0x77   : > { %v1307_v34 = vadd.f32 %v1306_v24, %v1295_v27  ;;  %v1347_v36 = vmul.f32 %v3186_v25, %v1346_v33  ;;  %v1358_v15 = vstv %s3260_s29  ;;  %v1355_v37 = vadd.f32 %v1354_v4, %v1344_v23  ;;  %s3804_s25 = sld [smem:[#allocation21_spill]] }
  0x78   : > { %v1466_v45 = vadd.f32 %v1465_v40, %v1454_v31  ;;  %v1469_v25 = vmul.f32 %v2648_v12, %v1301_v48  ;;  %v1450_v46 = vmul.f32 %v2644_v2, %v1282_v5  ;;  %2649 = vtanh.f32 %v1351_v41  ;;  %s3308_s17 = sld [smem:[#allocation12]] }
  0x79   : > { %v1320_v43 = vadd.f32 %v1319_v29, %v1307_v34  ;;  %v1458_v28 = vadd.f32 %v1457_v20, %v1447_v42  ;;  %v1461_v47 = vmul.f32 %v2646_v7, %v1293_v11  ;;  %v1473_v51 = vmul.f32 %v2648_v12, %v1305_v14  ;;  %s3805_s0 = sld [smem:[#allocation23_spill]] }
  0x7a   : > { %2651 = vtanh.f32 %v1355_v37  ;;  %v1479_v44 = vadd.f32 %v3199_v35, %v1466_v45  ;;  %v1486_v48 = vmul.f32 %v3181_v22, %v1318_v26  ;;  %v1500_v56 = vmul.f32 %v3223_v49, %v1332_v30  ;;  %s3326_s30 = sld [smem:[#allocation12 + $0x100]] }
  0x7b   : > { %v1334_v39 = vadd.f32 %v1333_v32, %v1320_v43  ;;  %v1470_v54 = vadd.f32 %v1469_v25, %v1458_v28  ;;  %v1462_v55 = vadd.f32 %v1461_v47, %v1450_v46  ;;  %v1514_v35 = vmul.f32 %v3226_v50, %v1346_v33  ;;  %s3807_s23 = sld [smem:[#allocation26_spill]] }
  0x7c   : > { %v1493_v57 = vadd.f32 %v3244_v60, %v1479_v44  ;;  %v1536_v58 = vstv %s3272_s24  ;;  %v1547_v59 = vstv %s3276_s8  ;;  %s3348_s24 = sld [smem:[#allocation12 + $0x81]]  ;;  %v1561_v7 = vstv %s3281_s9 }
  0x7d   : > { %s3306_s5 = scalar_lea.vmem %s3804_s25, %s3066_s4  ;;  %s3322_s4 = sld [smem:[#allocation12 + $0x80]]  ;;  %v1348_v22 = vadd.f32 %v1347_v36, %v1334_v39  ;;  %v1483_v49 = vadd.f32 %v3252_v0, %v1470_v54  ;;  %v1474_v50 = vadd.f32 %v1473_v51, %v1462_v55  ;;  %v1574_v8 = vstv %s3287_s19 }
  0x7e   : > { %v3317_v52 = vld [vmem:[%s3306_s5] sm:$0x3]  ;;  %v3320_v53 = vld [vmem:[%s3306_s5 + $0x2] sm:$0x3]  ;;  %v3332_v62 = vld [vmem:[%s3306_s5 + $0x4] sm:$0x3]  ;;  %v1507_v5 = vadd.f32 %v3247_v61, %v1493_v57  ;;  %v2650_v0 = vpop.eup %2649  ;;  %v1606_v21 = vstv %s3308_s17 }
  0x7f   : > { %s1107_s2 = scalar_lea.vmem %s3805_s0, %s3090_s26  ;;  %s3334_s0 = sld [smem:[#allocation12 + $0x1]]  ;;  %v1537_v63 = vmul.f32 %v1536_v58, %v3317_v52  ;;  %v1548_v60 = vmul.f32 %v3320_v53, %v1547_v59  ;;  %v1359_v3 = vadd.f32 %v1358_v15, %v1348_v22  ;;  %v1497_v9 = vadd.f32 %v3255_v1, %v1483_v49  ;;  %v3366_v16 = vld [vmem:[%s3306_s5] sm:$0x3]  ;;  %v3378_v24 = vld [vmem:[%s3306_s5 + $0x2] sm:$0x3] }
  0x80   : > { %s3806_s25 = smul.u32 24, %s3819_s3  ;;  %v3346_v2 = vld [vmem:[%s1107_s2] sm:$0x3]  ;;  %s3355_s8 = sld [smem:[#allocation12 + $0x2]]  ;;  %v1487_v10 = vadd.f32 %v1486_v48, %v1474_v50  ;;  %v1562_v12 = vmul.f32 %v3332_v62, %v1561_v7  ;;  %v2652_v13 = vpop.eup %2651  ;;  %v1518_v61 = vadd.f32 %v1507_v5, %v1350_v38  ;;  %v1586_v38 = vstv %s3300_s15  ;;  %v3393_v31 = vld [vmem:[%s3306_s5 + $0x4] sm:$0x3] }
  0x81   : > { %v1549_v11 = vadd.f32 %v1548_v60, %v1537_v63  ;;  %s3359_s2 = sld [smem:[#allocation9 + $0x80]]  ;;  %2653 = vtanh.f32 %v1359_v3  ;;  %v1575_v14 = vmul.f32 %v1574_v8, %v3346_v2  ;;  %v1511_v1 = vadd.f32 %v3263_v6, %v1497_v9  ;;  %s1130_s11 = scalar_lea.vmem %s3807_s23, %s3090_s26 }
  0x82   : > { %s3341_s10 = scalar_lea.vmem %s3766_s22, %s3806_s25  ;;  %s3368_s9 = sld [smem:[#allocation9 + $0x81]]  ;;  %v1501_v17 = vadd.f32 %v1500_v56, %v1487_v10  ;;  %2655 = vtanh.f32 %v1518_v61  ;;  %v1607_v29 = vmul.f32 %v1606_v21, %v3366_v16  ;;  %v3412_v34 = vld [vmem:[%s1130_s11] sm:$0x3] }
  0x83   : > { %1361 = vst [vmem:[%s3341_s10] sm:$0x3] %v2650_v0  ;;  %v1563_v19 = vadd.f32 %v1562_v12, %v1549_v11  ;;  %s3373_s19 = sld [smem:[#allocation9 + $0x82]]  ;;  %v1522_v26 = vadd.f32 %v1511_v1, %v1354_v4 }
  0x84   : > { %2378 = vst [vmem:[%s3341_s10 + $0x2] sm:$0x3] %v2652_v13  ;;  %s3380_s25 = sld [smem:[#allocation9 + $0x83]]  ;;  %v1515_v6 = vadd.f32 %v1514_v35, %v1501_v17 }
  0x85   : > { %v1576_v27 = vadd.f32 %v1575_v14, %v1563_v19  ;;  %s3385_s17 = sld [smem:[#allocation10 + $0x1]]  ;;  %v1616_v30 = vstv %s3334_s0  ;;  %2657 = vtanh.f32 %v1522_v26 }
  0x86   : > { %s3395_s15 = sld [smem:[#allocation9 + $0x100]]  ;;  %v1526_v4 = vadd.f32 %v1515_v6, %v1358_v15  ;;  %v1617_v23 = vmul.f32 %v3378_v24, %v1616_v30  ;;  %v1629_v33 = vstv %s3355_s8 }
  0x87   : > { %s3809_s14 = sld [smem:[#allocation24_spill]]  ;;  %v1587_v18 = vadd.f32 %v1586_v38, %v1576_v27  ;;  %v2654_v32 = vpop.eup %2653  ;;  %v1630_v15 = vmul.f32 %v3393_v31, %v1629_v33  ;;  %v1539_v42 = vstv %s3359_s2 }
  0x88   : > { %s3407_s0 = sld [smem:[#allocation9 + $0x101]]  ;;  %2379 = vst [vmem:[%s3341_s10 + $0x4] sm:$0x3] %v2654_v32  ;;  %2659 = vtanh.f32 %v1526_v4  ;;  %v1618_v36 = vadd.f32 %v1617_v23, %v1607_v29  ;;  %v2656_v41 = vpop.eup %2655  ;;  %v1551_v20 = vstv %s3368_s9  ;;  %v1540_v43 = vmul.f32 %v1539_v42, %v3317_v52 }
  0x89   : > { %s3410_s5 = sld [smem:[#allocation9 + $0x102]]  ;;  %2661 = vtanh.f32 %v1587_v18  ;;  %2419 = vst [vmem:[%s3341_s10 + $0x6] sm:$0x3] %v2656_v41  ;;  %v1552_v45 = vmul.f32 %v3320_v53, %v1551_v20  ;;  %v1565_v25 = vstv %s3373_s19  ;;  %v1620_v41 = vstv %s3348_s24  ;;  %s3811_s24 = sshll.u32 %s3819_s3, 4 }
  0x8a   : > { %s3419_s13 = sld [smem:[#allocation10 + $0x2]]  ;;  %v1631_v47 = vadd.f32 %v1630_v15, %v1618_v36  ;;  %v1566_v51 = vmul.f32 %v3332_v62, %v1565_v25  ;;  %v1578_v39 = vstv %s3380_s25 }
  0x8b   : > { %s3425_s11 = sld [smem:[#allocation12 + $0x3]]  ;;  %v2658_v28 = vpop.eup %2657  ;;  %v1553_v48 = vadd.f32 %v1552_v45, %v1540_v43  ;;  %v1579_v54 = vmul.f32 %v1578_v39, %v3346_v2  ;;  %v1590_v3 = vstv %s3385_s17 }
  0x8c   : > { %s3440_s29 = sld [smem:[#allocation12 + $0x5]]  ;;  %2420 = vst [vmem:[%s3341_s10 + $0x8] sm:$0x3] %v2658_v28  ;;  %v1542_v55 = vstv %s3395_s15 }
  0x8d   : > { %s3402_s16 = scalar_lea.vmem %s3809_s14, %s3808_s12  ;;  %s3416_s12 = sld [smem:[#allocation9 + $0x103]]  ;;  %v1543_v57 = vmul.f32 %v1542_v55, %v3317_v52  ;;  %v1567_v60 = vadd.f32 %v1566_v51, %v1553_v48 }
  0x8e   : > { %v1640_v40 = vld [vmem:[%s3402_s16] sm:$0x3]  ;;  %v2453_v37 = vld [vmem:[%s3402_s16 + $0x2] sm:$0x3]  ;;  %s3433_s14 = sld [smem:[#allocation12 + $0x4]]  ;;  %v1555_v56 = vstv %s3407_s0  ;;  %v2660_v22 = vpop.eup %2659 }
  0x8f   : > { %v3431_v46 = vmul.f32 %v1640_v40, %v3412_v34  ;;  %v3438_v44 = vmul.f32 %v2453_v37, %v3412_v34  ;;  %v2457_v35 = vld [vmem:[%s3402_s16 + $0x4] sm:$0x3]  ;;  %s3447_s8 = sld [smem:[#allocation12 + $0x6]]  ;;  %v1556_v58 = vmul.f32 %v3320_v53, %v1555_v56  ;;  %v1569_v59 = vstv %s3410_s5  ;;  %v2461_v50 = vld [vmem:[%s3402_s16 + $0x6] sm:$0x3]  ;;  %v2662_v63 = vpop.eup %2661 }
  0x90   : > { %s3454_s2 = sld [smem:[#allocation12 + $0x7]]  ;;  %2421 = vst [vmem:[%s3341_s10 + $0xa] sm:$0x3] %v2660_v22  ;;  %v1570_v5 = vmul.f32 %v3332_v62, %v1569_v59  ;;  %v2465_v52 = vld [vmem:[%s3402_s16 + $0x8] sm:$0x3]  ;;  %v1594_v8 = vstv %s3419_s13  ;;  %v3467_v9 = vmul.f32 %v2457_v35, %v3412_v34  ;;  %v1580_v62 = vadd.f32 %v1579_v54, %v1567_v60 }
  0x91   : > { %s3461_s9 = sld [smem:[#allocation12 + $0x8]]  ;;  %2437 = vst [vmem:[%s3341_s10 + $0xc] sm:$0x3] %v2662_v63  ;;  %v1557_v53 = vadd.f32 %v1556_v58, %v1543_v57  ;;  %v1643_v0 = vstv %s3425_s11  ;;  %v3476_v11 = vmul.f32 %v2461_v50, %v3412_v34  ;;  %v3481_v14 = vmul.f32 %v2465_v52, %v3412_v34  ;;  %v2469_v1 = vld [vmem:[%s3402_s16 + $0xa] sm:$0x3] }
  0x92   : > { %s3469_s19 = sld [smem:[#allocation12 + $0x9]]  ;;  %v1673_v61 = vstv %s3440_s29  ;;  %v1591_v17 = vadd.f32 %v1590_v3, %v1580_v62  ;;  %v2473_v27 = vld [vmem:[%s3402_s16 + $0xc] sm:$0x3]  ;;  %v3498_v4 = vmul.f32 %v2469_v1, %v3412_v34  ;;  %v2477_v32 = vld [vmem:[%s3402_s16 + $0xe] sm:$0x3]  ;;  %v1609_v40 = vstv %s3322_s4 }
  0x93   : > { %v1582_v49 = vstv %s3416_s12  ;;  %s3471_s23 = sld [smem:[#allocation12 + $0x101]]  ;;  %v1571_v12 = vadd.f32 %v1570_v5, %v1557_v53  ;;  %v1674_v21 = vmul.f32 %v1673_v61, %v3467_v9  ;;  %v3506_v15 = vmul.f32 %v2473_v27, %v3412_v34 }
  0x94   : > { %v1583_v7 = vmul.f32 %v1582_v49, %v3346_v2  ;;  %v1644_v2 = vmul.f32 %v1643_v0, %v3431_v46  ;;  %v1658_v10 = vstv %s3433_s14  ;;  %s3484_s25 = sld [smem:[#allocation12 + $0xa]]  ;;  %2663 = vtanh.f32 %v1591_v17 }
  0x95   : > { %v1659_v13 = vmul.f32 %v1658_v10, %v3438_v44  ;;  %s3486_s17 = sld [smem:[#allocation12 + $0x82]]  ;;  %v1688_v38 = vstv %s3447_s8  ;;  %v3521_v43 = vmul.f32 %v2477_v32, %v3412_v34  ;;  %v1610_v28 = vmul.f32 %v1609_v40, %v3366_v16 }
  0x96   : > { %v1645_v19 = vadd.f32 %v1644_v2, %v1631_v47  ;;  %v1584_v26 = vadd.f32 %v1583_v7, %v1571_v12  ;;  %v1703_v6 = vstv %s3454_s2  ;;  %s3492_s7 = sld [smem:[#allocation12 + $0xb]]  ;;  %v1689_v30 = vmul.f32 %v1688_v38, %v3476_v11 }
  0x97   : > { %s3494_s1 = sld [smem:[#allocation12 + $0x102]]  ;;  %v1718_v23 = vstv %s3461_s9  ;;  %v1704_v36 = vmul.f32 %v1703_v6, %v3481_v14  ;;  %v1621_v47 = vmul.f32 %v3378_v24, %v1620_v41 }
  0x98   : > { %v1660_v29 = vadd.f32 %v1659_v13, %v1645_v19  ;;  %v1595_v18 = vadd.f32 %v1594_v8, %v1584_v26  ;;  %s3502_s15 = sld [smem:[#allocation12 + $0xc]]  ;;  %v1733_v37 = vstv %s3469_s19  ;;  %v1719_v20 = vmul.f32 %v1718_v23, %v3498_v4 }
  0x99   : > { %s3508_s27 = sld [smem:[#allocation12 + $0xd]]  ;;  %v1734_v39 = vmul.f32 %v1733_v37, %v3506_v15  ;;  %v1622_v59 = vadd.f32 %v1621_v47, %v1610_v28  ;;  %v1612_v23 = vstv %s3326_s30 }
  0x9a   : > { %v1675_v33 = vadd.f32 %v1674_v21, %v1660_v29  ;;  %2665 = vtanh.f32 %v1595_v18  ;;  %s3513_s0 = sld [smem:[#allocation12 + $0xe]]  ;;  %v1748_v45 = vstv %s3484_s25  ;;  %v2664_v25 = vpop.eup %2663 }
  0x9b   : > { %s3810_s12 = sld [smem:[#allocation22_spill]]  ;;  %v1633_v48 = vstv %s3486_s17  ;;  %2438 = vst [vmem:[%s3341_s10 + $0xe] sm:$0x3] %v2664_v25  ;;  %v1749_v35 = vmul.f32 %v1748_v45, %v3521_v43 }
  0x9c   : > { %v1690_v42 = vadd.f32 %v1689_v30, %v1675_v33  ;;  %s3523_s11 = sld [smem:[#allocation12 + $0xf]]  ;;  %v1761_v55 = vstv %s3492_s7  ;;  %v1634_v49 = vmul.f32 %v3393_v31, %v1633_v48 }
  0x9d   : > { %s3526_s4 = sld [smem:[#allocation12 + $0x10]] }
  0x9e   : > { %s3812_s29 = sld [smem:[#allocation25_spill]]  ;;  %v1705_v51 = vadd.f32 %v1704_v36, %v1690_v42  ;;  %v1774_v58 = vstv %s3502_s15  ;;  %v1635_v8 = vadd.f32 %v1634_v49, %v1622_v59 }
  0x9f   : > { %s3538_s2 = sld [smem:[#allocation12 + $0x11]]  ;;  %v1788_v3 = vstv %s3508_s27 }
  0xa0   : > { %s3545_s3 = sld [smem:[#allocation12 + $0x12]]  ;;  %v1720_v56 = vadd.f32 %v1719_v20, %v1705_v51  ;;  %v2666_v22 = vpop.eup %2665  ;;  %v1802_v53 = vstv %s3513_s0  ;;  %v1624_v20 = vstv %s3471_s23 }
  0xa1   : > { %s1100_s13 = scalar_lea.vmem %s3810_s12, %s3090_s26  ;;  %s3548_s9 = sld [smem:[#allocation12 + $0x13]]  ;;  %2439 = vst [vmem:[%s3341_s10 + $0x10] sm:$0x3] %v2666_v22 }
  0xa2   : > { %v3542_v54 = vld [vmem:[%s1100_s13] sm:$0x3]  ;;  %s2451_s19 = sld [smem:[#allocation12 + $0x83]]  ;;  %v1735_v50 = vadd.f32 %v1734_v39, %v1720_v56  ;;  %v1816_v10 = vstv %s3523_s11 }
  0xa3   : > { %v1762_v63 = vmul.f32 %v1761_v55, %v3542_v54  ;;  %s2455_s25 = sld [smem:[#allocation12 + $0x84]]  ;;  %v1830_v38 = vstv %s3526_s4  ;;  %v1613_v55 = vmul.f32 %v1612_v23, %v3366_v16 }
  0xa4   : > { %s3535_s8 = scalar_lea.vmem %s3812_s29, %s3811_s24  ;;  %s2459_s17 = sld [smem:[#allocation12 + $0x85]]  ;;  %v1750_v5 = vadd.f32 %v1749_v35, %v1735_v50 }
  0xa5   : > { %v3551_v57 = vld [vmem:[%s3535_s8] sm:$0x3]  ;;  %v3558_v60 = vld [vmem:[%s3535_s8 + $0x2] sm:$0x3]  ;;  %s3562_s7 = sld [smem:[#allocation12 + $0x86]]  ;;  %v1844_v33 = vstv %s3538_s2 }
  0xa6   : > { %v1775_v7 = vmul.f32 %v1774_v58, %v3551_v57  ;;  %v3565_v52 = vld [vmem:[%s3535_s8 + $0x4] sm:$0x3]  ;;  %s3568_s15 = sld [smem:[#allocation12 + $0x87]]  ;;  %v1763_v0 = vadd.f32 %v1762_v63, %v1750_v5  ;;  %v1789_v62 = vmul.f32 %v3558_v60, %v1788_v3  ;;  %v3572_v2 = vld [vmem:[%s3535_s8 + $0x6] sm:$0x3]  ;;  %v1858_v25 = vstv %s3545_s3 }
  0xa7   : > { %s3575_s27 = sld [smem:[#allocation12 + $0x88]]  ;;  %v1803_v61 = vmul.f32 %v3565_v52, %v1802_v53  ;;  %v1817_v19 = vmul.f32 %v3572_v2, %v1816_v10  ;;  %v3585_v21 = vld [vmem:[%s3535_s8 + $0x8] sm:$0x3]  ;;  %v3597_v32 = vld [vmem:[%s3535_s8 + $0xa] sm:$0x3]  ;;  %v1872_v35 = vstv %s3548_s9  ;;  %v1625_v63 = vmul.f32 %v3378_v24, %v1624_v20 }
  0xa8   : > { %v1647_v12 = vstv %s2451_s19  ;;  %s3577_s16 = sld [smem:[#allocation12 + $0x89]]  ;;  %v1776_v13 = vadd.f32 %v1775_v7, %v1763_v0  ;;  %v1831_v41 = vmul.f32 %v3585_v21, %v1830_v38  ;;  %v3609_v45 = vld [vmem:[%s3535_s8 + $0xc] sm:$0x3]  ;;  %v1845_v51 = vmul.f32 %v3597_v32, %v1844_v33  ;;  %v3621_v56 = vld [vmem:[%s3535_s8 + $0xe] sm:$0x3] }
  0xa9   : > { %s3580_s0 = sld [smem:[#allocation12 + $0x14]]  ;;  %v1648_v1 = vmul.f32 %v1647_v12, %v3431_v46  ;;  %v1662_v17 = vstv %s2455_s25  ;;  %v1859_v59 = vmul.f32 %v3609_v45, %v1858_v25  ;;  %v1637_v3 = vstv %s3494_s1 }
  0xaa   : > { %v1663_v26 = vmul.f32 %v1662_v17, %v3438_v44  ;;  %v1677_v6 = vstv %s2459_s17  ;;  %s3589_s5 = sld [smem:[#allocation12 + $0x8a]]  ;;  %v1790_v27 = vadd.f32 %v1789_v62, %v1776_v13  ;;  %v1873_v53 = vmul.f32 %v3621_v56, %v1872_v35 }
  0xab   : > { %s3591_s12 = sld [smem:[#allocation12 + $0x15]]  ;;  %v1649_v29 = vadd.f32 %v1648_v1, %v1635_v8  ;;  %v1678_v30 = vmul.f32 %v1677_v6, %v3467_v9  ;;  %v1692_v18 = vstv %s3562_s7  ;;  %v1626_v1 = vadd.f32 %v1625_v63, %v1613_v55 }
  0xac   : > { %v1707_v36 = vstv %s3568_s15  ;;  %s3601_s13 = sld [smem:[#allocation12 + $0x8b]]  ;;  %v1804_v40 = vadd.f32 %v1803_v61, %v1790_v27  ;;  %v1693_v42 = vmul.f32 %v1692_v18, %v3476_v11  ;;  %v1638_v17 = vmul.f32 %v3393_v31, %v1637_v3 }
  0xad   : > { %s3604_s11 = sld [smem:[#allocation13]]  ;;  %v1664_v37 = vadd.f32 %v1663_v26, %v1649_v29  ;;  %v1722_v28 = vstv %s3575_s27  ;;  %v1708_v48 = vmul.f32 %v1707_v36, %v3481_v14 }
  0xae   : > { %s3613_s30 = sld [smem:[#allocation12 + $0x8c]]  ;;  %v1818_v47 = vadd.f32 %v1817_v19, %v1804_v40  ;;  %v1737_v22 = vstv %s3577_s16  ;;  %v1723_v50 = vmul.f32 %v1722_v28, %v3498_v4  ;;  %v1639_v31 = vadd.f32 %v1638_v17, %v1626_v1 }
  0xaf   : > { %v1679_v39 = vadd.f32 %v1678_v30, %v1664_v37  ;;  %s3617_s4 = sld [smem:[#allocation12 + $0x8d]]  ;;  %v1884_v16 = vstv %s3580_s0  ;;  %v1738_v0 = vmul.f32 %v1737_v22, %v3506_v15 }
  0xb0   : > { %s3625_s23 = sld [smem:[#allocation12 + $0x8e]]  ;;  %v1832_v58 = vadd.f32 %v1831_v41, %v1818_v47  ;;  %v1752_v5 = vstv %s3589_s5  ;;  %v1885_v12 = vmul.f32 %v1884_v16, %v3542_v54 }
  0xb1   : > { %v1694_v49 = vadd.f32 %v1693_v42, %v1679_v39  ;;  %s3629_s24 = sld [smem:[#allocation12 + $0x8f]]  ;;  %v1896_v62 = vstv %s3591_s12  ;;  %v1753_v61 = vmul.f32 %v1752_v5, %v3521_v43 }
  0xb2   : > { %s3635_s26 = sld [smem:[#allocation12 + $0x90]]  ;;  %v1846_v7 = vadd.f32 %v1845_v51, %v1832_v58  ;;  %v1765_v10 = vstv %s3601_s13  ;;  %v1897_v26 = vmul.f32 %v1896_v62, %v3412_v34 }
  0xb3   : > { %v1709_v8 = vadd.f32 %v1708_v48, %v1694_v49  ;;  %s3639_s14 = sld [smem:[#allocation12 + $0x91]]  ;;  %v1766_v27 = vmul.f32 %v1765_v10, %v3542_v54  ;;  %v1908_v36 = vstv %s3604_s11 }
  0xb4   : > { %s3643_s29 = sld [smem:[#allocation12 + $0x92]]  ;;  %v1860_v24 = vadd.f32 %v1859_v59, %v1846_v7  ;;  %v1778_v19 = vstv %s3613_s30 }
  0xb5   : > { %v1724_v13 = vadd.f32 %v1723_v50, %v1709_v8  ;;  %s3647_s1 = sld [smem:[#allocation12 + $0x93]]  ;;  %v1792_v29 = vstv %s3617_s4  ;;  %v1779_v23 = vmul.f32 %v1778_v19, %v3551_v57 }
  0xb6   : > { %s2452_s8 = sld [smem:[#allocation12 + $0x103]]  ;;  %v1874_v38 = vadd.f32 %v1873_v53, %v1860_v24  ;;  %v1806_v33 = vstv %s3625_s23  ;;  %v1793_v37 = vmul.f32 %v3558_v60, %v1792_v29 }
  0xb7   : > { %v1739_v6 = vadd.f32 %v1738_v0, %v1724_v13  ;;  %s2456_s2 = sld [smem:[#allocation12 + $0x104]]  ;;  %v1820_v42 = vstv %s3629_s24  ;;  %v1807_v20 = vmul.f32 %v3565_v52, %v1806_v33 }
  0xb8   : > { %s3654_s3 = sld [smem:[#allocation12 + $0x105]]  ;;  %v1886_v30 = vadd.f32 %v1885_v12, %v1874_v38  ;;  %v1821_v48 = vmul.f32 %v3572_v2, %v1820_v42  ;;  %v1834_v55 = vstv %s3635_s26 }
  0xb9   : > { %v1754_v18 = vadd.f32 %v1753_v61, %v1739_v6  ;;  %s3658_s9 = sld [smem:[#allocation12 + $0x106]]  ;;  %v1835_v3 = vmul.f32 %v3585_v21, %v1834_v55 }
  0xba   : > { %s3661_s19 = sld [smem:[#allocation12 + $0x107]]  ;;  %v1898_v40 = vadd.f32 %v1897_v26, %v1886_v30  ;;  %v1862_v7 = vstv %s3643_s29 }
  0xbb   : > { %v1767_v41 = vadd.f32 %v1766_v27, %v1754_v18  ;;  %s3665_s25 = sld [smem:[#allocation12 + $0x108]]  ;;  %v1876_v10 = vstv %s3647_s1  ;;  %v1863_v13 = vmul.f32 %v3609_v45, %v1862_v7 }
  0xbc   : > { %v1651_v25 = vstv %s2452_s8  ;;  %s3668_s17 = sld [smem:[#allocation12 + $0x109]]  ;;  %v1909_v28 = vadd.f32 %v1908_v36, %v1898_v40  ;;  %v1877_v38 = vmul.f32 %v3621_v56, %v1876_v10 }
  0xbd   : > { %v1780_v47 = vadd.f32 %v1779_v23, %v1767_v41  ;;  %s3670_s7 = sld [smem:[#allocation12 + $0x94]]  ;;  %v1652_v51 = vmul.f32 %v1651_v25, %v3431_v46  ;;  %v1666_v39 = vstv %s2456_s2  ;;  %v1848_v46 = vstv %s3639_s14 }
  0xbe   : > { %v1667_v35 = vmul.f32 %v1666_v39, %v3438_v44  ;;  %v1681_v22 = vstv %s3654_s3  ;;  %s3677_s15 = sld [smem:[#allocation12 + $0x10a]]  ;;  %2667 = vtanh.f32 %v1909_v28  ;;  %v1849_v8 = vmul.f32 %v3597_v32, %v1848_v46 }
  0xbf   : > { %v1794_v58 = vadd.f32 %v1793_v37, %v1780_v47  ;;  %s3679_s27 = sld [smem:[#allocation12 + $0x95]]  ;;  %v1653_v59 = vadd.f32 %v1652_v51, %v1639_v31  ;;  %v1682_v49 = vmul.f32 %v1681_v22, %v3467_v9  ;;  %v1696_v50 = vstv %s3658_s9 }
  0xc0   : > { %v1711_v63 = vstv %s3661_s19  ;;  %s3685_s16 = sld [smem:[#allocation12 + $0x10b]]  ;;  %v1697_v5 = vmul.f32 %v1696_v50, %v3476_v11 }
  0xc1   : > { %v1808_v44 = vadd.f32 %v1807_v20, %v1794_v58  ;;  %v1668_v16 = vadd.f32 %v1667_v35, %v1653_v59  ;;  %v1726_v53 = vstv %s3665_s25  ;;  %s3691_s0 = sld [smem:[#allocation12 + $0x10c]]  ;;  %v1712_v62 = vmul.f32 %v1711_v63, %v3481_v14 }
  0xc2   : > { %v1741_v24 = vstv %s3668_s17  ;;  %s3697_s5 = sld [smem:[#allocation12 + $0x10d]]  ;;  %v1727_v1 = vmul.f32 %v1726_v53, %v3498_v4 }
  0xc3   : > { %v1822_v9 = vadd.f32 %v1821_v48, %v1808_v44  ;;  %v1683_v0 = vadd.f32 %v1682_v49, %v1668_v16  ;;  %s3700_s12 = sld [smem:[#allocation13 + $0x1]]  ;;  %v1888_v17 = vstv %s3670_s7  ;;  %v1742_v6 = vmul.f32 %v1741_v24, %v3506_v15 }
  0xc4   : > { %v2668_v11 = vpop.eup %2667  ;;  %v1756_v19 = vstv %s3677_s15  ;;  %s3706_s13 = sld [smem:[#allocation12 + $0x10e]]  ;;  %v1889_v4 = vmul.f32 %v1888_v17, %v3542_v54 }
  0xc5   : > { %v1836_v12 = vadd.f32 %v1835_v3, %v1822_v9  ;;  %v1698_v61 = vadd.f32 %v1697_v5, %v1683_v0  ;;  %2523 = vst [vmem:[%s3341_s10 + $0x12] sm:$0x3] %v2668_v11  ;;  %v1900_v27 = vstv %s3679_s27  ;;  %s3712_s11 = sld [smem:[#allocation12 + $0x10f]]  ;;  %v1757_v23 = vmul.f32 %v1756_v19, %v3521_v43 }
  0xc6   : > { %v1769_v29 = vstv %s3685_s16  ;;  %s2502_s30 = sld [smem:[#allocation12 + $0x110]]  ;;  %v1901_v36 = vmul.f32 %v1900_v27, %v3412_v34 }
  0xc7   : > { %v1850_v14 = vadd.f32 %v1849_v8, %v1836_v12  ;;  %v1713_v26 = vadd.f32 %v1712_v62, %v1698_v61  ;;  %v1782_v33 = vstv %s3691_s0  ;;  %v1770_v15 = vmul.f32 %v1769_v29, %v3542_v54  ;;  %s2506_s4 = sld [smem:[#allocation12 + $0x111]] }
  0xc8   : > { %v1796_v41 = vstv %s3697_s5  ;;  %v1783_v20 = vmul.f32 %v1782_v33, %v3551_v57  ;;  %s2510_s23 = sld [smem:[#allocation12 + $0x112]] }
  0xc9   : > { %v1864_v30 = vadd.f32 %v1863_v13, %v1850_v14  ;;  %v1728_v18 = vadd.f32 %v1727_v1, %v1713_v26  ;;  %v1912_v25 = vstv %s3700_s12  ;;  %v1797_v51 = vmul.f32 %v3558_v60, %v1796_v41  ;;  %s2514_s24 = sld [smem:[#allocation12 + $0x113]] }
  0xca   : > { %v1810_v28 = vstv %s3706_s13  ;;  %s2517_s26 = sld [smem:[#allocation12 + $0x114]] }
  0xcb   : > { %v1878_v31 = vadd.f32 %v1877_v38, %v1864_v30  ;;  %v1743_v40 = vadd.f32 %v1742_v6, %v1728_v18  ;;  %v1824_v39 = vstv %s3712_s11  ;;  %v1811_v35 = vmul.f32 %v3565_v52, %v1810_v28  ;;  %s2520_s14 = sld [smem:[#allocation12 + $0x115]] }
  0xcc   : > { %v1838_v22 = vstv %s2502_s30  ;;  %v1825_v57 = vmul.f32 %v3572_v2, %v1824_v39  ;;  %s2522_s29 = sld [smem:[#allocation13 + $0x2]] }
  0xcd   : > { %v1890_v37 = vadd.f32 %v1889_v4, %v1878_v31  ;;  %v1758_v42 = vadd.f32 %v1757_v23, %v1743_v40  ;;  %v1852_v59 = vstv %s2506_s4  ;;  %v1839_v46 = vmul.f32 %v3585_v21, %v1838_v22 }
  0xce   : > { %v1866_v50 = vstv %s2510_s23  ;;  %v1853_v63 = vmul.f32 %v3597_v32, %v1852_v59 }
  0xcf   : > { %v1902_v47 = vadd.f32 %v1901_v36, %v1890_v37  ;;  %v1771_v43 = vadd.f32 %v1770_v15, %v1758_v42  ;;  %v1880_v44 = vstv %s2514_s24  ;;  %v1867_v52 = vmul.f32 %v3609_v45, %v1866_v50 }
  0xd0   : > { %v1892_v5 = vstv %s2517_s26  ;;  %v1881_v2 = vmul.f32 %v3621_v56, %v1880_v44 }
  0xd1   : > { %v1913_v48 = vadd.f32 %v1912_v25, %v1902_v47  ;;  %v1784_v55 = vadd.f32 %v1783_v20, %v1771_v43  ;;  %v1904_v53 = vstv %s2520_s14  ;;  %v1893_v21 = vmul.f32 %v1892_v5, %v3542_v54 }
  0xd2   : > { %v1905_v0 = vmul.f32 %v1904_v53, %v3412_v34  ;;  %v1916_v62 = vstv %s2522_s29 }
  0xd3   : > { %2669 = vtanh.f32 %v1913_v48  ;;  %v1798_v58 = vadd.f32 %v1797_v51, %v1784_v55 }
  0xd5   : > { %v1812_v49 = vadd.f32 %v1811_v35, %v1798_v58 }
  0xd7   : > { %v1826_v60 = vadd.f32 %v1825_v57, %v1812_v49 }
  0xd9   : > { %v2670_v3 = vpop.eup %2669  ;;  %v1840_v16 = vadd.f32 %v1839_v46, %v1826_v60 }
  0xda   : > { %2524 = vst [vmem:[%s3341_s10 + $0x14] sm:$0x3] %v2670_v3 }
  0xdb   : > { %v1854_v7 = vadd.f32 %v1853_v63, %v1840_v16 }
  0xdd   : > { %v1868_v9 = vadd.f32 %v1867_v52, %v1854_v7 }
  0xdf   : > { %v1882_v8 = vadd.f32 %v1881_v2, %v1868_v9 }
  0xe1   : > { %v1894_v32 = vadd.f32 %v1893_v21, %v1882_v8 }
  0xe3   : > { %v1906_v10 = vadd.f32 %v1905_v0, %v1894_v32 }
  0xe5   : > { %v1917_v24 = vadd.f32 %v1916_v62, %v1906_v10 }
  0xe7   : > { %2671 = vtanh.f32 %v1917_v24 }
  0xed   : > { %v2672_v45 = vpop.eup %2671 }
  0xee   : > { %2525 = vst [vmem:[%s3341_s10 + $0x16] sm:$0x3] %v2672_v45 }
  0xef PF: > { %s3813_s1 = sld [smem:[#allocation20_spill]]  ;;  %s3814_s3 = smov %s2831_s28 }
  0xf0   : > { %s3815_s28 = smov %s3817_s6 }
  0xf5   : > { %s37_s29 = sadd.s32 1, %s3813_s1  }
  0xf6   : > { %p34_p8 = scmp.ge.s32.totalorder %s37_s29, 4  }
  0xf8   :  { %36 = sbr.rel (!%p34_p8) target bundleno = 26 (0x1a), region = 245 }
  0xfd   :  { %1952 = vsyncpa [#allocation3], 1 }
  0xfe   :  { %1954 = vsyncpa [#allocation3 + $0x1], 1 }
  0xff   :  { %1955 = vsyncpa [#allocation5], 1 }
 0x100   :  { %1956 = vsyncpa [#allocation8], 1 }
 0x101   :  { %1957 = vsyncpa [#allocation11], 1 }
 0x102   :  { %1958 = vsyncpa [#allocation14], 1 }

</bundles_post_ra>
